<compile_context>
chip_gen: v5e
topology: v5e:2x2
jax: 0.10.0
libtpu: 0.0.40
codegen_flags: <defaults>
</compile_context>

<pallas_src>
import math

import jax
import jax.numpy as jnp
import numpy as np
from jax.experimental import pallas as pl
from jax.experimental.pallas import tpu as pltpu

F32 = jnp.float32
EPS = 1e-5            # nn.LayerNorm default eps
NETS = 7              # 3 novelty + 3 quality + 1 coherence
NP = 8                # padded to 8 segments -> packed widths 8*2H / 8*H (x128 lanes)


# --------------------------- packed-slab lane layouts ---------------------------
def _lane_layout(fields):
    """Assign each (name, width) a 128-aligned lane offset inside a packed slab."""
    layout, off = {}, 0
    for name, width in fields:
        layout[name] = (off, width)
        off += ((width + 127) // 128) * 128
    return layout, off


def _row_fields(H, C1, C2):
    return [
        ("b1", C1), ("g1", C1), ("be1", C1),
        ("b2", C2), ("g2", C2), ("be2", C2),
        ("b3", 6 + H),            # [b3_nov(3) | b3_qual(3) | b3_coh(H)]
        ("batt", H),              # bv @ wo + bo  (fused attention bias)
        ("wm_n", H), ("wm_q", H), ("bm1", H), ("gm1", H), ("bem1", H), ("bm2", 3),
        ("wc_n", H), ("wc_q", H), ("bc1", H), ("gc1", H), ("bec1", H), ("bc2", 1),
        ("bt1", H), ("gt1", H), ("bet1", H), ("bt2", 3),
    ]


def _wh_fields(H):
    return [
        ("att", H),        # wv @ wo (fused attention weight)
        ("mc", 2 * H),     # [wm_c | wc_c]
        ("m2", 3), ("c2", 1), ("t2", 3),
        ("ceT", 3),        # wc_e.T (H, 3)
    ]


# ------------------------------- forward builder --------------------------------
def make_forward(input_dim, hidden_dim, batch=3):
    D, H, B = input_dim, hidden_dim, batch
    assert B == 3, "literal PyTorch threshold broadcast requires batch == 3"
    assert 15 + H <= 128, "output slab layout assumes hidden_dim <= 113"
    H2 = 2 * H
    C1, C2 = NP * H2, NP * H
    ROW, _ = _lane_layout(_row_fields(H, C1, C2))
    WH, _ = _lane_layout(_wh_fields(H))

    # ----- in-kernel helpers (exact sigmoid/softmax: values feed hard thresholds)
    def _sigmoid(v):
        return 1.0 / (1.0 + jnp.exp(-v))

    def _softmax(v):
        e = jnp.exp(v - jnp.max(v, axis=-1, keepdims=True))
        return e / jnp.sum(e, axis=-1, keepdims=True)

    def _layernorm(v, g, b):
        mu = jnp.mean(v, axis=-1, keepdims=True)
        var = jnp.mean((v - mu) ** 2, axis=-1, keepdims=True)
        return (v - mu) * jax.lax.rsqrt(var + EPS) * g + b

    def _seg_layernorm(h, ind, segw, g, b):
        """LayerNorm per contiguous lane segment via a (NP, C) one-hot indicator.
        One matmul for stacked [sum; sum_sq], one for broadcasting stacked
        [mean; rstd] back to lane space."""
        hh = jnp.concatenate([h, h * h], axis=0)                       # (2B, C)
        sums = jax.lax.dot_general(hh, ind, (((1,), (1,)), ((), ())),
                                   preferred_element_type=F32)          # (2B, NP)
        inv = 1.0 / float(segw)
        mean_s = sums[:B] * inv
        var_s = sums[B:] * inv - mean_s * mean_s
        rstd_s = jax.lax.rsqrt(var_s + EPS)
        stat = jnp.concatenate([mean_s, rstd_s], axis=0)                 # (2B, NP)
        bc = jax.lax.dot_general(stat, ind, (((1,), (0,)), ((), ())),
                                 preferred_element_type=F32)             # (2B, C)
        return (h - bc[:B]) * bc[B:] * g + b

    # ----------------------------------- kernel -----------------------------------
    def kernel(x_ref, win_ref, w2_ref, wh2_ref, wh_ref, row_ref, ind_ref, out_ref):
        def rp(name):                               # 1-row param (static aligned slice)
            off, w = ROW[name]
            return row_ref[:, off:off + w]          # (1, w)

        def wp(name):                               # H-row weight block
            off, w = WH[name]
            return wh_ref[:, off:off + w]           # (H, w)

        x = x_ref[...]                              # (B, D)
        ind1 = ind_ref[:, :C1]                      # (NP, C1)
        ind2 = ind_ref[:, C1:]                      # (NP, C2)

        # --- fused layer-1 matmul: 7(+1 dummy) sub-nets + threshold net ----------
        xw = jnp.dot(x, win_ref[...], preferred_element_type=F32)       # (B, C1+H)
        h1 = jnp.maximum(xw[:, :C1] + rp("b1"), 0.0)
        h1 = _seg_layernorm(h1, ind1, H2, rp("g1"), rp("be1"))
        # Dropout(0.1): identity in eval mode.
        h2 = jnp.maximum(jnp.dot(h1, w2_ref[...],
                                 preferred_element_type=F32) + rp("b2"), 0.0)
        h2 = _seg_layernorm(h2, ind2, H, rp("g2"), rp("be2"))

        # --- all 7 heads in one matmul: [nov(3) | qual(3) | coherence(H)] --------
        heads = jnp.dot(h2, wh2_ref[...], preferred_element_type=F32) + rp("b3")
        nov = _sigmoid(heads[:, 0:3])                                    # (B, 3)
        qual = _sigmoid(heads[:, 3:6])                                   # (B, 3)
        coh = jnp.tanh(heads[:, 6:6 + H])                                # (B, H)

        # --- self-attention over a length-1 sequence: softmax == 1 exactly, so
        #     attended = out_proj(v_proj(coh)); both projections fused at init.
        coh_att = jnp.dot(coh, wp("att"), preferred_element_type=F32) + rp("batt")

        # --- shared coh_att projection for meta/confidence ([wm_c | wc_c] fused) -
        mc = jnp.dot(coh_att, wp("mc"), preferred_element_type=F32)      # (B, 2H)

        nov_mean = jnp.mean(nov, axis=-1, keepdims=True)                 # (B, 1)
        qual_mean = jnp.mean(qual, axis=-1, keepdims=True)               # (B, 1)

        # --- meta evaluation (concat folded into split weights) ------------------
        m = nov_mean * rp("wm_n") + qual_mean * rp("wm_q") + mc[:, :H] + rp("bm1")
        m = _layernorm(jnp.maximum(m, 0.0), rp("gm1"), rp("bem1"))
        ew = _softmax(jnp.dot(m, wp("m2"), preferred_element_type=F32) + rp("bm2"))

        # --- confidence -----------------------------------------------------------
        ce = jax.lax.dot_general(ew, wp("ceT"), (((1,), (1,)), ((), ())),
                                 preferred_element_type=F32)             # ew @ wc_e
        c = (nov_mean * rp("wc_n") + qual_mean * rp("wc_q")
             + mc[:, H:] + ce + rp("bc1"))
        c = _layernorm(jnp.maximum(c, 0.0), rp("gc1"), rp("bec1"))
        conf = _sigmoid(jnp.dot(c, wp("c2"), preferred_element_type=F32) + rp("bc2"))

        # --- thresholds (layer-1 already fused into xw) ---------------------------
        t = jnp.maximum(xw[:, C1:] + rp("bt1"), 0.0)
        t = _layernorm(t, rp("gt1"), rp("bet1"))
        thr = _sigmoid(jnp.dot(t, wp("t2"), preferred_element_type=F32) + rp("bt2"))

        # --- final gating.  The reference broadcasts (B,3,1) > (B,1), i.e. the
        # threshold is indexed by the NET index (only valid when B == 3);
        # reproduced exactly, vectorized: lane j compares against thr[j, 0/1].
        lane3 = jax.lax.broadcasted_iota(jnp.int32, (1, 3), 1)
        t_nov = jnp.where(lane3 == 0, thr[0:1, 0:1],
                          jnp.where(lane3 == 1, thr[1:2, 0:1], thr[2:3, 0:1]))
        t_qual = jnp.where(lane3 == 0, thr[0:1, 1:2],
                           jnp.where(lane3 == 1, thr[1:2, 1:2], thr[2:3, 1:2]))
        fn = jnp.sum(jnp.where(nov > t_nov, nov, 0.0),
                     axis=-1, keepdims=True) * (1.0 / 3.0)               # mean over nets
        fq = jnp.sum(jnp.where(qual > t_qual, qual, 0.0),
                     axis=-1, keepdims=True) * (1.0 / 3.0)
        fc = jnp.where(coh_att > thr[:, 2:3], coh_att, 0.0)              # (B, H)

        # --- single lane-dense (8, 128) output slab -> one unmasked store / DMA ---
        pieces = [fn, fq, conf, fc, nov, qual, ew, thr]
        pad_w = 128 - (15 + H)
        if pad_w:
            pieces.append(jnp.zeros((B, pad_w), F32))
        packed = jnp.concatenate(pieces, axis=1)                         # (B, 128)
        out_ref[...] = jnp.concatenate(
            [packed, jnp.zeros((8 - B, 128), F32)], axis=0)              # (8, 128)

    vmem = pl.BlockSpec(memory_space=pltpu.MemorySpace.VMEM)

    @jax.jit
    def forward(x, slabs):
        out = pl.pallas_call(
            kernel,
            out_shape=jax.ShapeDtypeStruct((8, 128), F32),
            in_specs=[vmem] * 7,
            out_specs=vmem,
        )(x, slabs["w_in"], slabs["w2p"], slabs["w_h2"],
          slabs["w_h"], slabs["row"], slabs["ind"])

        fn = out[:B, 0:1]
        fq = out[:B, 1:2]
        conf = out[:B, 2:3]
        fc = out[:B, 3:3 + H]
        nov = out[:B, 3 + H:6 + H]
        qual = out[:B, 6 + H:9 + H]
        ew = out[:B, 9 + H:12 + H]
        thr = out[:B, 12 + H:15 + H]

        metadata = {
            "novelty_scores": nov[:, :, None],                           # (B, 3, 1)
            "quality_scores": qual[:, :, None],                          # (B, 3, 1)
            # softmax over a length-1 key sequence is exactly 1 (head-averaged)
            "coherence_attention": jnp.ones((B, 1, 1), F32),             # (N, L, S)
            "evaluation_weights": ew,                                    # (B, 3)
            "confidence": conf,                                          # (B, 1)
            "thresholds": thr,                                           # (B, 3)
        }
        return fn, fq, fc, metadata

    return forward


# ------------------------------ parameter packing --------------------------------
def init_params(key, input_dim, hidden_dim):
    D, H = input_dim, hidden_dim
    H2 = 2 * H
    C1, C2 = NP * H2, NP * H
    ROW, row_n = _lane_layout(_row_fields(H, C1, C2))
    WH, wh_n = _lane_layout(_wh_fields(H))

    keys = iter(jax.random.split(key, 40))

    def lin(din, dout):
        kw, kb = jax.random.split(next(keys))
        s = 1.0 / math.sqrt(din)
        w = np.asarray(jax.random.uniform(kw, (din, dout), F32, -s, s))
        b = np.asarray(jax.random.uniform(kb, (dout,), F32, -s, s))
        return w, b

    w_in = np.zeros((D, C1 + H), np.float32)       # [w1 packed | wt1]
    w2p = np.zeros((C1, C2), np.float32)           # block-diagonal layer-2
    w_h2 = np.zeros((C2, 6 + H), np.float32)       # [nov heads | qual heads | coherence]
    w_h = np.zeros((H, wh_n), np.float32)
    row = np.zeros((1, row_n), np.float32)
    ind = np.zeros((NP, C1 + C2), np.float32)

    def put_row(name, vec):
        off, _w = ROW[name]
        vec = np.asarray(vec, np.float32).reshape(-1)
        row[0, off:off + vec.shape[0]] = vec

    def put_wh(name, mat):
        off, _w = WH[name]
        w_h[:, off:off + mat.shape[1]] = np.asarray(mat, np.float32)

    b1 = np.zeros(C1, np.float32)
    b2 = np.zeros(C2, np.float32)
    b3 = np.zeros(6 + H, np.float32)

    # 7 real sub-nets (segment 7 is an all-zero pad, only there for lane density)
    for i in range(NETS):
        w1, bb1 = lin(D, H2)
        w2, bb2 = lin(H2, H)
        w3, bb3 = lin(H, H if i == 6 else 1)
        w_in[:, i * H2:(i + 1) * H2] = w1
        b1[i * H2:(i + 1) * H2] = bb1
        w2p[i * H2:(i + 1) * H2, i * H:(i + 1) * H] = w2
        b2[i * H:(i + 1) * H] = bb2
        if i < 6:                         # novelty heads -> cols 0:3, quality -> cols 3:6
            w_h2[i * H:(i + 1) * H, i] = w3[:, 0]
            b3[i] = bb3[0]
        else:                             # coherence head -> cols 6:6+H
            w_h2[i * H:(i + 1) * H, 6:6 + H] = w3
            b3[6:6 + H] = bb3

    put_row("b1", b1); put_row("g1", np.ones(C1)); put_row("be1", np.zeros(C1))
    put_row("b2", b2); put_row("g2", np.ones(C2)); put_row("be2", np.zeros(C2))
    put_row("b3", b3)

    # threshold network (first layer fused into the same x-matmul)
    wt1, bt1 = lin(D, H)
    w_in[:, C1:C1 + H] = wt1
    put_row("bt1", bt1); put_row("gt1", np.ones(H)); put_row("bet1", np.zeros(H))
    wt2, bt2 = lin(H, 3)
    put_wh("t2", wt2); put_row("bt2", bt2)

    # attention (embed=H, 8 heads) on a length-1 sequence: softmax == 1, so only
    # v_proj / out_proj matter -> fold them into one weight/bias at init.
    wv, bv = lin(H, H)
    wo, bo = lin(H, H)
    put_wh("att", wv @ wo)
    put_row("batt", bv @ wo + bo)

    # TODO(synk): the reference declares Linear(3H, H) / Linear(4H, H) for
    # meta_evaluation / confidence, but its forward feeds H+2 / H+5 features
    # (shape mismatch for every valid hidden_dim); weights sized to the forward.
    wm, bm1 = lin(H + 2, H)
    put_row("wm_n", wm[0]); put_row("wm_q", wm[1]); put_row("bm1", bm1)
    put_row("gm1", np.ones(H)); put_row("bem1", np.zeros(H))
    wm2, bm2 = lin(H, 3)
    put_wh("m2", wm2); put_row("bm2", bm2)

    wc, bc1 = lin(H + 5, H)
    put_row("wc_n", wc[0]); put_row("wc_q", wc[1]); put_row("bc1", bc1)
    put_row("gc1", np.ones(H)); put_row("bec1", np.zeros(H))
    wc2, bc2 = lin(H, 1)
    put_wh("c2", wc2); put_row("bc2", bc2)
    put_wh("mc", np.concatenate([wm[2:], wc[2:2 + H]], axis=1))   # [wm_c | wc_c]
    put_wh("ceT", wc[2 + H:].T)                                   # (H, 3)

    # segment indicators, lane-major: ind1 (NP, C1) | ind2 (NP, C2)
    ind[np.arange(C1) // H2, np.arange(C1)] = 1.0
    ind[np.arange(C2) // H, C1 + np.arange(C2)] = 1.0

    return {
        "w_in": jnp.asarray(w_in), "w2p": jnp.asarray(w2p),
        "w_h2": jnp.asarray(w_h2), "w_h": jnp.asarray(w_h),
        "row": jnp.asarray(row), "ind": jnp.asarray(ind),
    }


# ------------------------------------- main ---------------------------------------
if __name__ == "__main__":
    B = 3            # required by the module's literal threshold broadcast (see header)
    INPUT_DIM = 16
    HIDDEN_DIM = 32  # divisible by num_heads=8

    key = jax.random.PRNGKey(0)
    kx, kp = jax.random.split(key)
    x = jax.random.normal(kx, (B, INPUT_DIM), jnp.float32)
    slabs = init_params(kp, INPUT_DIM, HIDDEN_DIM)
    forward = make_forward(INPUT_DIM, HIDDEN_DIM, B)

    final_novelty, final_quality, final_coherence, metadata = forward(x, slabs)
    jax.block_until_ready(final_coherence)
    jax.block_until_ready(metadata["evaluation_weights"])

    assert final_novelty.shape == (B, 1)
    assert final_quality.shape == (B, 1)
    assert final_coherence.shape == (B, HIDDEN_DIM)
    assert metadata["novelty_scores"].shape == (B, 3, 1)
    assert metadata["quality_scores"].shape == (B, 3, 1)
    assert metadata["coherence_attention"].shape == (B, 1, 1)
    assert metadata["evaluation_weights"].shape == (B, 3)
    assert metadata["confidence"].shape == (B, 1)
    assert metadata["thresholds"].shape == (B, 3)
    assert bool(jnp.all(jnp.isfinite(final_coherence)))
    # exact softmax -> rows sum to 1 within f32 rounding
    assert bool(jnp.all(jnp.abs(jnp.sum(metadata["evaluation_weights"], axis=-1) - 1.0) < 1e-5))
    assert bool(jnp.all((metadata["confidence"] > 0.0) & (metadata["confidence"] < 1.0)))
    assert bool(jnp.all((metadata["thresholds"] > 0.0) & (metadata["thresholds"] < 1.0)))
    print("KERNEL_OK")
</pallas_src>

<mosaic_0001>
module attributes {stable_mosaic.version = 11 : i64} {
  func.func @kernel(%arg0: memref<3x16xf32, #tpu.memory_space<vmem>>, %arg1: memref<16x544xf32, #tpu.memory_space<vmem>>, %arg2: memref<512x256xf32, #tpu.memory_space<vmem>>, %arg3: memref<256x38xf32, #tpu.memory_space<vmem>>, %arg4: memref<32x768xf32, #tpu.memory_space<vmem>>, %arg5: memref<1x4608xf32, #tpu.memory_space<vmem>>, %arg6: memref<8x768xf32, #tpu.memory_space<vmem>>, %arg7: memref<8x128xf32, #tpu.memory_space<vmem>>) attributes {dimension_semantics = [], scalar_prefetch = 0 : i64, scratch_operands = 0 : i64, tpu.core_type = #tpu.core_type<tc>} {
    %c0 = arith.constant 0 : index
    %c0_0 = arith.constant 0 : index
    %0 = vector.load %arg0[%c0, %c0_0] : memref<3x16xf32, #tpu.memory_space<vmem>>, vector<3x16xf32>
    %c0_1 = arith.constant 0 : index
    %c0_2 = arith.constant 0 : index
    %1 = vector.load %arg6[%c0_1, %c0_2] : memref<8x768xf32, #tpu.memory_space<vmem>>, vector<8x512xf32>
    %c0_3 = arith.constant 0 : index
    %c512 = arith.constant 512 : index
    %2 = vector.load %arg6[%c0_3, %c512] : memref<8x768xf32, #tpu.memory_space<vmem>>, vector<8x256xf32>
    %c0_4 = arith.constant 0 : index
    %c0_5 = arith.constant 0 : index
    %3 = vector.load %arg1[%c0_4, %c0_5] : memref<16x544xf32, #tpu.memory_space<vmem>>, vector<16x544xf32>
    %cst = arith.constant dense<0.000000e+00> : vector<3x544xf32>
    %4 = tpu.matmul %0, %3, %cst {dimension_numbers = #tpu.dot_dimension_numbers<[1], [0], [0], [1], [0, 0, 1, 1], [], []>} : vector<3x16xf32>, vector<16x544xf32>, vector<3x544xf32> -> vector<3x544xf32>
    %5 = vector.extract_strided_slice %4 {offsets = [0, 0], sizes = [3, 512], strides = [1, 1]} : vector<3x544xf32> to vector<3x512xf32>
    %c0_6 = arith.constant 0 : index
    %c0_7 = arith.constant 0 : index
    %6 = vector.load %arg5[%c0_6, %c0_7] : memref<1x4608xf32, #tpu.memory_space<vmem>>, vector<1x512xf32>
    %7 = vector.broadcast %6 : vector<1x512xf32> to vector<3x512xf32>
    %8 = arith.addf %5, %7 : vector<3x512xf32>
    %cst_8 = arith.constant 0.000000e+00 : f32
    %9 = vector.broadcast %cst_8 : f32 to vector<3x512xf32>
    %10 = arith.maximumf %8, %9 : vector<3x512xf32>
    %c0_9 = arith.constant 0 : index
    %c512_10 = arith.constant 512 : index
    %11 = vector.load %arg5[%c0_9, %c512_10] : memref<1x4608xf32, #tpu.memory_space<vmem>>, vector<1x512xf32>
    %c0_11 = arith.constant 0 : index
    %c1024 = arith.constant 1024 : index
    %12 = vector.load %arg5[%c0_11, %c1024] : memref<1x4608xf32, #tpu.memory_space<vmem>>, vector<1x512xf32>
    %13 = arith.mulf %10, %10 : vector<3x512xf32>
    %14 = tpu.concatenate %10, %13 in 0 : vector<3x512xf32>, vector<3x512xf32> -> vector<6x512xf32>
    %cst_12 = arith.constant dense<0.000000e+00> : vector<6x8xf32>
    %15 = tpu.matmul %14, %1, %cst_12 {dimension_numbers = #tpu.dot_dimension_numbers<[1], [1], [0], [0], [0, 0, 1, 0], [], []>} : vector<6x512xf32>, vector<8x512xf32>, vector<6x8xf32> -> vector<6x8xf32>
    %16 = vector.extract_strided_slice %15 {offsets = [0, 0], sizes = [3, 8], strides = [1, 1]} : vector<6x8xf32> to vector<3x8xf32>
    %cst_13 = arith.constant 1.562500e-02 : f32
    %17 = vector.broadcast %cst_13 : f32 to vector<3x8xf32>
    %18 = arith.mulf %16, %17 : vector<3x8xf32>
    %19 = vector.extract_strided_slice %15 {offsets = [3, 0], sizes = [3, 8], strides = [1, 1]} : vector<6x8xf32> to vector<3x8xf32>
    %cst_14 = arith.constant 1.562500e-02 : f32
    %20 = vector.broadcast %cst_14 : f32 to vector<3x8xf32>
    %21 = arith.mulf %19, %20 : vector<3x8xf32>
    %22 = arith.mulf %18, %18 : vector<3x8xf32>
    %23 = arith.subf %21, %22 : vector<3x8xf32>
    %cst_15 = arith.constant 9.99999974E-6 : f32
    %24 = vector.broadcast %cst_15 : f32 to vector<3x8xf32>
    %25 = arith.addf %23, %24 : vector<3x8xf32>
    %26 = math.rsqrt %25 : vector<3x8xf32>
    %27 = tpu.concatenate %18, %26 in 0 : vector<3x8xf32>, vector<3x8xf32> -> vector<6x8xf32>
    %cst_16 = arith.constant dense<0.000000e+00> : vector<6x512xf32>
    %28 = tpu.matmul %27, %1, %cst_16 {dimension_numbers = #tpu.dot_dimension_numbers<[1], [0], [0], [1], [0, 0, 1, 1], [], []>} : vector<6x8xf32>, vector<8x512xf32>, vector<6x512xf32> -> vector<6x512xf32>
    %29 = vector.extract_strided_slice %28 {offsets = [0, 0], sizes = [3, 512], strides = [1, 1]} : vector<6x512xf32> to vector<3x512xf32>
    %30 = arith.subf %10, %29 : vector<3x512xf32>
    %31 = vector.extract_strided_slice %28 {offsets = [3, 0], sizes = [3, 512], strides = [1, 1]} : vector<6x512xf32> to vector<3x512xf32>
    %32 = arith.mulf %30, %31 : vector<3x512xf32>
    %33 = vector.broadcast %11 : vector<1x512xf32> to vector<3x512xf32>
    %34 = arith.mulf %32, %33 : vector<3x512xf32>
    %35 = vector.broadcast %12 : vector<1x512xf32> to vector<3x512xf32>
    %36 = arith.addf %34, %35 : vector<3x512xf32>
    %c0_17 = arith.constant 0 : index
    %c0_18 = arith.constant 0 : index
    %37 = vector.load %arg2[%c0_17, %c0_18] : memref<512x256xf32, #tpu.memory_space<vmem>>, vector<512x256xf32>
    %cst_19 = arith.constant dense<0.000000e+00> : vector<3x256xf32>
    %38 = tpu.matmul %36, %37, %cst_19 {dimension_numbers = #tpu.dot_dimension_numbers<[1], [0], [0], [1], [0, 0, 1, 1], [], []>} : vector<3x512xf32>, vector<512x256xf32>, vector<3x256xf32> -> vector<3x256xf32>
    %c0_20 = arith.constant 0 : index
    %c1536 = arith.constant 1536 : index
    %39 = vector.load %arg5[%c0_20, %c1536] : memref<1x4608xf32, #tpu.memory_space<vmem>>, vector<1x256xf32>
    %40 = vector.broadcast %39 : vector<1x256xf32> to vector<3x256xf32>
    %41 = arith.addf %38, %40 : vector<3x256xf32>
    %cst_21 = arith.constant 0.000000e+00 : f32
    %42 = vector.broadcast %cst_21 : f32 to vector<3x256xf32>
    %43 = arith.maximumf %41, %42 : vector<3x256xf32>
    %c0_22 = arith.constant 0 : index
    %c1792 = arith.constant 1792 : index
    %44 = vector.load %arg5[%c0_22, %c1792] : memref<1x4608xf32, #tpu.memory_space<vmem>>, vector<1x256xf32>
    %c0_23 = arith.constant 0 : index
    %c2048 = arith.constant 2048 : index
    %45 = vector.load %arg5[%c0_23, %c2048] : memref<1x4608xf32, #tpu.memory_space<vmem>>, vector<1x256xf32>
    %46 = arith.mulf %43, %43 : vector<3x256xf32>
    %47 = tpu.concatenate %43, %46 in 0 : vector<3x256xf32>, vector<3x256xf32> -> vector<6x256xf32>
    %cst_24 = arith.constant dense<0.000000e+00> : vector<6x8xf32>
    %48 = tpu.matmul %47, %2, %cst_24 {dimension_numbers = #tpu.dot_dimension_numbers<[1], [1], [0], [0], [0, 0, 1, 0], [], []>} : vector<6x256xf32>, vector<8x256xf32>, vector<6x8xf32> -> vector<6x8xf32>
    %49 = vector.extract_strided_slice %48 {offsets = [0, 0], sizes = [3, 8], strides = [1, 1]} : vector<6x8xf32> to vector<3x8xf32>
    %cst_25 = arith.constant 3.125000e-02 : f32
    %50 = vector.broadcast %cst_25 : f32 to vector<3x8xf32>
    %51 = arith.mulf %49, %50 : vector<3x8xf32>
    %52 = vector.extract_strided_slice %48 {offsets = [3, 0], sizes = [3, 8], strides = [1, 1]} : vector<6x8xf32> to vector<3x8xf32>
    %cst_26 = arith.constant 3.125000e-02 : f32
    %53 = vector.broadcast %cst_26 : f32 to vector<3x8xf32>
    %54 = arith.mulf %52, %53 : vector<3x8xf32>
    %55 = arith.mulf %51, %51 : vector<3x8xf32>
    %56 = arith.subf %54, %55 : vector<3x8xf32>
    %cst_27 = arith.constant 9.99999974E-6 : f32
    %57 = vector.broadcast %cst_27 : f32 to vector<3x8xf32>
    %58 = arith.addf %56, %57 : vector<3x8xf32>
    %59 = math.rsqrt %58 : vector<3x8xf32>
    %60 = tpu.concatenate %51, %59 in 0 : vector<3x8xf32>, vector<3x8xf32> -> vector<6x8xf32>
    %cst_28 = arith.constant dense<0.000000e+00> : vector<6x256xf32>
    %61 = tpu.matmul %60, %2, %cst_28 {dimension_numbers = #tpu.dot_dimension_numbers<[1], [0], [0], [1], [0, 0, 1, 1], [], []>} : vector<6x8xf32>, vector<8x256xf32>, vector<6x256xf32> -> vector<6x256xf32>
    %62 = vector.extract_strided_slice %61 {offsets = [0, 0], sizes = [3, 256], strides = [1, 1]} : vector<6x256xf32> to vector<3x256xf32>
    %63 = arith.subf %43, %62 : vector<3x256xf32>
    %64 = vector.extract_strided_slice %61 {offsets = [3, 0], sizes = [3, 256], strides = [1, 1]} : vector<6x256xf32> to vector<3x256xf32>
    %65 = arith.mulf %63, %64 : vector<3x256xf32>
    %66 = vector.broadcast %44 : vector<1x256xf32> to vector<3x256xf32>
    %67 = arith.mulf %65, %66 : vector<3x256xf32>
    %68 = vector.broadcast %45 : vector<1x256xf32> to vector<3x256xf32>
    %69 = arith.addf %67, %68 : vector<3x256xf32>
    %c0_29 = arith.constant 0 : index
    %c0_30 = arith.constant 0 : index
    %70 = vector.load %arg3[%c0_29, %c0_30] : memref<256x38xf32, #tpu.memory_space<vmem>>, vector<256x38xf32>
    %cst_31 = arith.constant dense<0.000000e+00> : vector<3x38xf32>
    %71 = tpu.matmul %69, %70, %cst_31 {dimension_numbers = #tpu.dot_dimension_numbers<[1], [0], [0], [1], [0, 0, 1, 1], [], []>} : vector<3x256xf32>, vector<256x38xf32>, vector<3x38xf32> -> vector<3x38xf32>
    %c0_32 = arith.constant 0 : index
    %c2304 = arith.constant 2304 : index
    %72 = vector.load %arg5[%c0_32, %c2304] : memref<1x4608xf32, #tpu.memory_space<vmem>>, vector<1x38xf32>
    %73 = vector.broadcast %72 : vector<1x38xf32> to vector<3x38xf32>
    %74 = arith.addf %71, %73 : vector<3x38xf32>
    %75 = vector.extract_strided_slice %74 {offsets = [0, 0], sizes = [3, 3], strides = [1, 1]} : vector<3x38xf32> to vector<3x3xf32>
    %cst_33 = arith.constant 0.000000e+00 : f32
    %76 = vector.broadcast %cst_33 : f32 to vector<3x3xf32>
    %77 = arith.subf %76, %75 : vector<3x3xf32>
    %78 = math.exp %77 : vector<3x3xf32>
    %cst_34 = arith.constant 1.000000e+00 : f32
    %79 = vector.broadcast %cst_34 : f32 to vector<3x3xf32>
    %80 = arith.addf %79, %78 : vector<3x3xf32>
    %cst_35 = arith.constant 1.000000e+00 : f32
    %81 = vector.broadcast %cst_35 : f32 to vector<3x3xf32>
    %82 = arith.divf %81, %80 : vector<3x3xf32>
    %83 = vector.extract_strided_slice %74 {offsets = [0, 3], sizes = [3, 3], strides = [1, 1]} : vector<3x38xf32> to vector<3x3xf32>
    %cst_36 = arith.constant 0.000000e+00 : f32
    %84 = vector.broadcast %cst_36 : f32 to vector<3x3xf32>
    %85 = arith.subf %84, %83 : vector<3x3xf32>
    %86 = math.exp %85 : vector<3x3xf32>
    %cst_37 = arith.constant 1.000000e+00 : f32
    %87 = vector.broadcast %cst_37 : f32 to vector<3x3xf32>
    %88 = arith.addf %87, %86 : vector<3x3xf32>
    %cst_38 = arith.constant 1.000000e+00 : f32
    %89 = vector.broadcast %cst_38 : f32 to vector<3x3xf32>
    %90 = arith.divf %89, %88 : vector<3x3xf32>
    %91 = vector.extract_strided_slice %74 {offsets = [0, 6], sizes = [3, 32], strides = [1, 1]} : vector<3x38xf32> to vector<3x32xf32>
    %92 = math.tanh %91 : vector<3x32xf32>
    %c0_39 = arith.constant 0 : index
    %c0_40 = arith.constant 0 : index
    %93 = vector.load %arg4[%c0_39, %c0_40] : memref<32x768xf32, #tpu.memory_space<vmem>>, vector<32x32xf32>
    %cst_41 = arith.constant dense<0.000000e+00> : vector<3x32xf32>
    %94 = tpu.matmul %92, %93, %cst_41 {dimension_numbers = #tpu.dot_dimension_numbers<[1], [0], [0], [1], [0, 0, 1, 1], [], []>} : vector<3x32xf32>, vector<32x32xf32>, vector<3x32xf32> -> vector<3x32xf32>
    %c0_42 = arith.constant 0 : index
    %c2432 = arith.constant 2432 : index
    %95 = vector.load %arg5[%c0_42, %c2432] : memref<1x4608xf32, #tpu.memory_space<vmem>>, vector<1x32xf32>
    %96 = vector.broadcast %95 : vector<1x32xf32> to vector<3x32xf32>
    %97 = arith.addf %94, %96 : vector<3x32xf32>
    %c0_43 = arith.constant 0 : index
    %c128 = arith.constant 128 : index
    %98 = vector.load %arg4[%c0_43, %c128] : memref<32x768xf32, #tpu.memory_space<vmem>>, vector<32x64xf32>
    %cst_44 = arith.constant dense<0.000000e+00> : vector<3x64xf32>
    %99 = tpu.matmul %97, %98, %cst_44 {dimension_numbers = #tpu.dot_dimension_numbers<[1], [0], [0], [1], [0, 0, 1, 1], [], []>} : vector<3x32xf32>, vector<32x64xf32>, vector<3x64xf32> -> vector<3x64xf32>
    %cst_45 = arith.constant dense<0.000000e+00> : vector<3xf32>
    %100 = vector.multi_reduction <add>, %82, %cst_45 [1] : vector<3x3xf32> to vector<3xf32>
    %101 = vector.shape_cast %100 : vector<3xf32> to vector<3x1xf32>
    %cst_46 = arith.constant 3.000000e+00 : f32
    %102 = vector.broadcast %cst_46 : f32 to vector<3x1xf32>
    %103 = arith.divf %101, %102 : vector<3x1xf32>
    %cst_47 = arith.constant dense<0.000000e+00> : vector<3xf32>
    %104 = vector.multi_reduction <add>, %90, %cst_47 [1] : vector<3x3xf32> to vector<3xf32>
    %105 = vector.shape_cast %104 : vector<3xf32> to vector<3x1xf32>
    %cst_48 = arith.constant 3.000000e+00 : f32
    %106 = vector.broadcast %cst_48 : f32 to vector<3x1xf32>
    %107 = arith.divf %105, %106 : vector<3x1xf32>
    %c0_49 = arith.constant 0 : index
    %c2560 = arith.constant 2560 : index
    %108 = vector.load %arg5[%c0_49, %c2560] : memref<1x4608xf32, #tpu.memory_space<vmem>>, vector<1x32xf32>
    %109 = vector.broadcast %103 : vector<3x1xf32> to vector<3x32xf32>
    %110 = vector.broadcast %108 : vector<1x32xf32> to vector<3x32xf32>
    %111 = arith.mulf %109, %110 : vector<3x32xf32>
    %c0_50 = arith.constant 0 : index
    %c2688 = arith.constant 2688 : index
    %112 = vector.load %arg5[%c0_50, %c2688] : memref<1x4608xf32, #tpu.memory_space<vmem>>, vector<1x32xf32>
    %113 = vector.broadcast %107 : vector<3x1xf32> to vector<3x32xf32>
    %114 = vector.broadcast %112 : vector<1x32xf32> to vector<3x32xf32>
    %115 = arith.mulf %113, %114 : vector<3x32xf32>
    %116 = arith.addf %111, %115 : vector<3x32xf32>
    %117 = vector.extract_strided_slice %99 {offsets = [0, 0], sizes = [3, 32], strides = [1, 1]} : vector<3x64xf32> to vector<3x32xf32>
    %118 = arith.addf %116, %117 : vector<3x32xf32>
    %c0_51 = arith.constant 0 : index
    %c2816 = arith.constant 2816 : index
    %119 = vector.load %arg5[%c0_51, %c2816] : memref<1x4608xf32, #tpu.memory_space<vmem>>, vector<1x32xf32>
    %120 = vector.broadcast %119 : vector<1x32xf32> to vector<3x32xf32>
    %121 = arith.addf %118, %120 : vector<3x32xf32>
    %cst_52 = arith.constant 0.000000e+00 : f32
    %122 = vector.broadcast %cst_52 : f32 to vector<3x32xf32>
    %123 = arith.maximumf %121, %122 : vector<3x32xf32>
    %c0_53 = arith.constant 0 : index
    %c2944 = arith.constant 2944 : index
    %124 = vector.load %arg5[%c0_53, %c2944] : memref<1x4608xf32, #tpu.memory_space<vmem>>, vector<1x32xf32>
    %c0_54 = arith.constant 0 : index
    %c3072 = arith.constant 3072 : index
    %125 = vector.load %arg5[%c0_54, %c3072] : memref<1x4608xf32, #tpu.memory_space<vmem>>, vector<1x32xf32>
    %cst_55 = arith.constant dense<0.000000e+00> : vector<3xf32>
    %126 = vector.multi_reduction <add>, %123, %cst_55 [1] : vector<3x32xf32> to vector<3xf32>
    %127 = vector.shape_cast %126 : vector<3xf32> to vector<3x1xf32>
    %cst_56 = arith.constant 3.200000e+01 : f32
    %128 = vector.broadcast %cst_56 : f32 to vector<3x1xf32>
    %129 = arith.divf %127, %128 : vector<3x1xf32>
    %130 = vector.broadcast %129 : vector<3x1xf32> to vector<3x32xf32>
    %131 = arith.subf %123, %130 : vector<3x32xf32>
    %132 = arith.mulf %131, %131 : vector<3x32xf32>
    %cst_57 = arith.constant dense<0.000000e+00> : vector<3xf32>
    %133 = vector.multi_reduction <add>, %132, %cst_57 [1] : vector<3x32xf32> to vector<3xf32>
    %134 = vector.shape_cast %133 : vector<3xf32> to vector<3x1xf32>
    %cst_58 = arith.constant 3.200000e+01 : f32
    %135 = vector.broadcast %cst_58 : f32 to vector<3x1xf32>
    %136 = arith.divf %134, %135 : vector<3x1xf32>
    %137 = vector.broadcast %129 : vector<3x1xf32> to vector<3x32xf32>
    %138 = arith.subf %123, %137 : vector<3x32xf32>
    %cst_59 = arith.constant 9.99999974E-6 : f32
    %139 = vector.broadcast %cst_59 : f32 to vector<3x1xf32>
    %140 = arith.addf %136, %139 : vector<3x1xf32>
    %141 = math.rsqrt %140 : vector<3x1xf32>
    %142 = vector.broadcast %141 : vector<3x1xf32> to vector<3x32xf32>
    %143 = arith.mulf %138, %142 : vector<3x32xf32>
    %144 = vector.broadcast %124 : vector<1x32xf32> to vector<3x32xf32>
    %145 = arith.mulf %143, %144 : vector<3x32xf32>
    %146 = vector.broadcast %125 : vector<1x32xf32> to vector<3x32xf32>
    %147 = arith.addf %145, %146 : vector<3x32xf32>
    %c0_60 = arith.constant 0 : index
    %c256 = arith.constant 256 : index
    %148 = vector.load %arg4[%c0_60, %c256] : memref<32x768xf32, #tpu.memory_space<vmem>>, vector<32x3xf32>
    %cst_61 = arith.constant dense<0.000000e+00> : vector<3x3xf32>
    %149 = tpu.matmul %147, %148, %cst_61 {dimension_numbers = #tpu.dot_dimension_numbers<[1], [0], [0], [1], [0, 0, 1, 1], [], []>} : vector<3x32xf32>, vector<32x3xf32>, vector<3x3xf32> -> vector<3x3xf32>
    %c0_62 = arith.constant 0 : index
    %c3200 = arith.constant 3200 : index
    %150 = vector.load %arg5[%c0_62, %c3200] : memref<1x4608xf32, #tpu.memory_space<vmem>>, vector<1x3xf32>
    %151 = vector.broadcast %150 : vector<1x3xf32> to vector<3x3xf32>
    %152 = arith.addf %149, %151 : vector<3x3xf32>
    %cst_63 = arith.constant dense<0xFF800000> : vector<3xf32>
    %153 = vector.multi_reduction <maximumf>, %152, %cst_63 [1] : vector<3x3xf32> to vector<3xf32>
    %154 = vector.shape_cast %153 : vector<3xf32> to vector<3x1xf32>
    %155 = vector.broadcast %154 : vector<3x1xf32> to vector<3x3xf32>
    %156 = arith.subf %152, %155 : vector<3x3xf32>
    %157 = math.exp %156 : vector<3x3xf32>
    %cst_64 = arith.constant dense<0.000000e+00> : vector<3xf32>
    %158 = vector.multi_reduction <add>, %157, %cst_64 [1] : vector<3x3xf32> to vector<3xf32>
    %159 = vector.shape_cast %158 : vector<3xf32> to vector<3x1xf32>
    %160 = vector.broadcast %159 : vector<3x1xf32> to vector<3x3xf32>
    %161 = arith.divf %157, %160 : vector<3x3xf32>
    %c0_65 = arith.constant 0 : index
    %c640 = arith.constant 640 : index
    %162 = vector.load %arg4[%c0_65, %c640] : memref<32x768xf32, #tpu.memory_space<vmem>>, vector<32x3xf32>
    %cst_66 = arith.constant dense<0.000000e+00> : vector<3x32xf32>
    %163 = tpu.matmul %161, %162, %cst_66 {dimension_numbers = #tpu.dot_dimension_numbers<[1], [1], [0], [0], [0, 0, 1, 0], [], []>} : vector<3x3xf32>, vector<32x3xf32>, vector<3x32xf32> -> vector<3x32xf32>
    %c0_67 = arith.constant 0 : index
    %c3328 = arith.constant 3328 : index
    %164 = vector.load %arg5[%c0_67, %c3328] : memref<1x4608xf32, #tpu.memory_space<vmem>>, vector<1x32xf32>
    %165 = vector.broadcast %103 : vector<3x1xf32> to vector<3x32xf32>
    %166 = vector.broadcast %164 : vector<1x32xf32> to vector<3x32xf32>
    %167 = arith.mulf %165, %166 : vector<3x32xf32>
    %c0_68 = arith.constant 0 : index
    %c3456 = arith.constant 3456 : index
    %168 = vector.load %arg5[%c0_68, %c3456] : memref<1x4608xf32, #tpu.memory_space<vmem>>, vector<1x32xf32>
    %169 = vector.broadcast %107 : vector<3x1xf32> to vector<3x32xf32>
    %170 = vector.broadcast %168 : vector<1x32xf32> to vector<3x32xf32>
    %171 = arith.mulf %169, %170 : vector<3x32xf32>
    %172 = arith.addf %167, %171 : vector<3x32xf32>
    %173 = vector.extract_strided_slice %99 {offsets = [0, 32], sizes = [3, 32], strides = [1, 1]} : vector<3x64xf32> to vector<3x32xf32>
    %174 = arith.addf %172, %173 : vector<3x32xf32>
    %175 = arith.addf %174, %163 : vector<3x32xf32>
    %c0_69 = arith.constant 0 : index
    %c3584 = arith.constant 3584 : index
    %176 = vector.load %arg5[%c0_69, %c3584] : memref<1x4608xf32, #tpu.memory_space<vmem>>, vector<1x32xf32>
    %177 = vector.broadcast %176 : vector<1x32xf32> to vector<3x32xf32>
    %178 = arith.addf %175, %177 : vector<3x32xf32>
    %cst_70 = arith.constant 0.000000e+00 : f32
    %179 = vector.broadcast %cst_70 : f32 to vector<3x32xf32>
    %180 = arith.maximumf %178, %179 : vector<3x32xf32>
    %c0_71 = arith.constant 0 : index
    %c3712 = arith.constant 3712 : index
    %181 = vector.load %arg5[%c0_71, %c3712] : memref<1x4608xf32, #tpu.memory_space<vmem>>, vector<1x32xf32>
    %c0_72 = arith.constant 0 : index
    %c3840 = arith.constant 3840 : index
    %182 = vector.load %arg5[%c0_72, %c3840] : memref<1x4608xf32, #tpu.memory_space<vmem>>, vector<1x32xf32>
    %cst_73 = arith.constant dense<0.000000e+00> : vector<3xf32>
    %183 = vector.multi_reduction <add>, %180, %cst_73 [1] : vector<3x32xf32> to vector<3xf32>
    %184 = vector.shape_cast %183 : vector<3xf32> to vector<3x1xf32>
    %cst_74 = arith.constant 3.200000e+01 : f32
    %185 = vector.broadcast %cst_74 : f32 to vector<3x1xf32>
    %186 = arith.divf %184, %185 : vector<3x1xf32>
    %187 = vector.broadcast %186 : vector<3x1xf32> to vector<3x32xf32>
    %188 = arith.subf %180, %187 : vector<3x32xf32>
    %189 = arith.mulf %188, %188 : vector<3x32xf32>
    %cst_75 = arith.constant dense<0.000000e+00> : vector<3xf32>
    %190 = vector.multi_reduction <add>, %189, %cst_75 [1] : vector<3x32xf32> to vector<3xf32>
    %191 = vector.shape_cast %190 : vector<3xf32> to vector<3x1xf32>
    %cst_76 = arith.constant 3.200000e+01 : f32
    %192 = vector.broadcast %cst_76 : f32 to vector<3x1xf32>
    %193 = arith.divf %191, %192 : vector<3x1xf32>
    %194 = vector.broadcast %186 : vector<3x1xf32> to vector<3x32xf32>
    %195 = arith.subf %180, %194 : vector<3x32xf32>
    %cst_77 = arith.constant 9.99999974E-6 : f32
    %196 = vector.broadcast %cst_77 : f32 to vector<3x1xf32>
    %197 = arith.addf %193, %196 : vector<3x1xf32>
    %198 = math.rsqrt %197 : vector<3x1xf32>
    %199 = vector.broadcast %198 : vector<3x1xf32> to vector<3x32xf32>
    %200 = arith.mulf %195, %199 : vector<3x32xf32>
    %201 = vector.broadcast %181 : vector<1x32xf32> to vector<3x32xf32>
    %202 = arith.mulf %200, %201 : vector<3x32xf32>
    %203 = vector.broadcast %182 : vector<1x32xf32> to vector<3x32xf32>
    %204 = arith.addf %202, %203 : vector<3x32xf32>
    %c0_78 = arith.constant 0 : index
    %c384 = arith.constant 384 : index
    %205 = vector.load %arg4[%c0_78, %c384] : memref<32x768xf32, #tpu.memory_space<vmem>>, vector<32x1xf32>
    %cst_79 = arith.constant dense<0.000000e+00> : vector<3x1xf32>
    %206 = tpu.matmul %204, %205, %cst_79 {dimension_numbers = #tpu.dot_dimension_numbers<[1], [0], [0], [1], [0, 0, 1, 1], [], []>} : vector<3x32xf32>, vector<32x1xf32>, vector<3x1xf32> -> vector<3x1xf32>
    %c0_80 = arith.constant 0 : index
    %c3968 = arith.constant 3968 : index
    %207 = vector.load %arg5[%c0_80, %c3968] : memref<1x4608xf32, #tpu.memory_space<vmem>>, vector<1x1xf32>
    %208 = vector.broadcast %207 : vector<1x1xf32> to vector<3x1xf32>
    %209 = arith.addf %206, %208 : vector<3x1xf32>
    %cst_81 = arith.constant 0.000000e+00 : f32
    %210 = vector.broadcast %cst_81 : f32 to vector<3x1xf32>
    %211 = arith.subf %210, %209 : vector<3x1xf32>
    %212 = math.exp %211 : vector<3x1xf32>
    %cst_82 = arith.constant 1.000000e+00 : f32
    %213 = vector.broadcast %cst_82 : f32 to vector<3x1xf32>
    %214 = arith.addf %213, %212 : vector<3x1xf32>
    %cst_83 = arith.constant 1.000000e+00 : f32
    %215 = vector.broadcast %cst_83 : f32 to vector<3x1xf32>
    %216 = arith.divf %215, %214 : vector<3x1xf32>
    %217 = vector.extract_strided_slice %4 {offsets = [0, 512], sizes = [3, 32], strides = [1, 1]} : vector<3x544xf32> to vector<3x32xf32>
    %c0_84 = arith.constant 0 : index
    %c4096 = arith.constant 4096 : index
    %218 = vector.load %arg5[%c0_84, %c4096] : memref<1x4608xf32, #tpu.memory_space<vmem>>, vector<1x32xf32>
    %219 = vector.broadcast %218 : vector<1x32xf32> to vector<3x32xf32>
    %220 = arith.addf %217, %219 : vector<3x32xf32>
    %cst_85 = arith.constant 0.000000e+00 : f32
    %221 = vector.broadcast %cst_85 : f32 to vector<3x32xf32>
    %222 = arith.maximumf %220, %221 : vector<3x32xf32>
    %c0_86 = arith.constant 0 : index
    %c4224 = arith.constant 4224 : index
    %223 = vector.load %arg5[%c0_86, %c4224] : memref<1x4608xf32, #tpu.memory_space<vmem>>, vector<1x32xf32>
    %c0_87 = arith.constant 0 : index
    %c4352 = arith.constant 4352 : index
    %224 = vector.load %arg5[%c0_87, %c4352] : memref<1x4608xf32, #tpu.memory_space<vmem>>, vector<1x32xf32>
    %cst_88 = arith.constant dense<0.000000e+00> : vector<3xf32>
    %225 = vector.multi_reduction <add>, %222, %cst_88 [1] : vector<3x32xf32> to vector<3xf32>
    %226 = vector.shape_cast %225 : vector<3xf32> to vector<3x1xf32>
    %cst_89 = arith.constant 3.200000e+01 : f32
    %227 = vector.broadcast %cst_89 : f32 to vector<3x1xf32>
    %228 = arith.divf %226, %227 : vector<3x1xf32>
    %229 = vector.broadcast %228 : vector<3x1xf32> to vector<3x32xf32>
    %230 = arith.subf %222, %229 : vector<3x32xf32>
    %231 = arith.mulf %230, %230 : vector<3x32xf32>
    %cst_90 = arith.constant dense<0.000000e+00> : vector<3xf32>
    %232 = vector.multi_reduction <add>, %231, %cst_90 [1] : vector<3x32xf32> to vector<3xf32>
    %233 = vector.shape_cast %232 : vector<3xf32> to vector<3x1xf32>
    %cst_91 = arith.constant 3.200000e+01 : f32
    %234 = vector.broadcast %cst_91 : f32 to vector<3x1xf32>
    %235 = arith.divf %233, %234 : vector<3x1xf32>
    %236 = vector.broadcast %228 : vector<3x1xf32> to vector<3x32xf32>
    %237 = arith.subf %222, %236 : vector<3x32xf32>
    %cst_92 = arith.constant 9.99999974E-6 : f32
    %238 = vector.broadcast %cst_92 : f32 to vector<3x1xf32>
    %239 = arith.addf %235, %238 : vector<3x1xf32>
    %240 = math.rsqrt %239 : vector<3x1xf32>
    %241 = vector.broadcast %240 : vector<3x1xf32> to vector<3x32xf32>
    %242 = arith.mulf %237, %241 : vector<3x32xf32>
    %243 = vector.broadcast %223 : vector<1x32xf32> to vector<3x32xf32>
    %244 = arith.mulf %242, %243 : vector<3x32xf32>
    %245 = vector.broadcast %224 : vector<1x32xf32> to vector<3x32xf32>
    %246 = arith.addf %244, %245 : vector<3x32xf32>
    %c0_93 = arith.constant 0 : index
    %c512_94 = arith.constant 512 : index
    %247 = vector.load %arg4[%c0_93, %c512_94] : memref<32x768xf32, #tpu.memory_space<vmem>>, vector<32x3xf32>
    %cst_95 = arith.constant dense<0.000000e+00> : vector<3x3xf32>
    %248 = tpu.matmul %246, %247, %cst_95 {dimension_numbers = #tpu.dot_dimension_numbers<[1], [0], [0], [1], [0, 0, 1, 1], [], []>} : vector<3x32xf32>, vector<32x3xf32>, vector<3x3xf32> -> vector<3x3xf32>
    %c0_96 = arith.constant 0 : index
    %c4480 = arith.constant 4480 : index
    %249 = vector.load %arg5[%c0_96, %c4480] : memref<1x4608xf32, #tpu.memory_space<vmem>>, vector<1x3xf32>
    %250 = vector.broadcast %249 : vector<1x3xf32> to vector<3x3xf32>
    %251 = arith.addf %248, %250 : vector<3x3xf32>
    %cst_97 = arith.constant 0.000000e+00 : f32
    %252 = vector.broadcast %cst_97 : f32 to vector<3x3xf32>
    %253 = arith.subf %252, %251 : vector<3x3xf32>
    %254 = math.exp %253 : vector<3x3xf32>
    %cst_98 = arith.constant 1.000000e+00 : f32
    %255 = vector.broadcast %cst_98 : f32 to vector<3x3xf32>
    %256 = arith.addf %255, %254 : vector<3x3xf32>
    %cst_99 = arith.constant 1.000000e+00 : f32
    %257 = vector.broadcast %cst_99 : f32 to vector<3x3xf32>
    %258 = arith.divf %257, %256 : vector<3x3xf32>
    %259 = tpu.iota {dimensions = array<i32: 1>} : vector<1x3xi32>
    %c0_i32 = arith.constant 0 : i32
    %260 = vector.broadcast %c0_i32 : i32 to vector<1x3xi32>
    %261 = arith.cmpi eq, %259, %260 : vector<1x3xi32>
    %262 = vector.extract_strided_slice %258 {offsets = [0, 0], sizes = [1, 1], strides = [1, 1]} : vector<3x3xf32> to vector<1x1xf32>
    %c1_i32 = arith.constant 1 : i32
    %263 = vector.broadcast %c1_i32 : i32 to vector<1x3xi32>
    %264 = arith.cmpi eq, %259, %263 : vector<1x3xi32>
    %265 = vector.extract_strided_slice %258 {offsets = [1, 0], sizes = [1, 1], strides = [1, 1]} : vector<3x3xf32> to vector<1x1xf32>
    %266 = vector.extract_strided_slice %258 {offsets = [2, 0], sizes = [1, 1], strides = [1, 1]} : vector<3x3xf32> to vector<1x1xf32>
    %267 = vector.shape_cast %265 : vector<1x1xf32> to vector<1x1xf32>
    %268 = vector.broadcast %267 : vector<1x1xf32> to vector<1x3xf32>
    %269 = vector.shape_cast %266 : vector<1x1xf32> to vector<1x1xf32>
    %270 = vector.broadcast %269 : vector<1x1xf32> to vector<1x3xf32>
    %271 = arith.select %264, %268, %270 : vector<1x3xi1>, vector<1x3xf32>
    %272 = vector.shape_cast %262 : vector<1x1xf32> to vector<1x1xf32>
    %273 = vector.broadcast %272 : vector<1x1xf32> to vector<1x3xf32>
    %274 = arith.select %261, %273, %271 : vector<1x3xi1>, vector<1x3xf32>
    %c0_i32_100 = arith.constant 0 : i32
    %275 = vector.broadcast %c0_i32_100 : i32 to vector<1x3xi32>
    %276 = arith.cmpi eq, %259, %275 : vector<1x3xi32>
    %277 = vector.extract_strided_slice %258 {offsets = [0, 1], sizes = [1, 1], strides = [1, 1]} : vector<3x3xf32> to vector<1x1xf32>
    %c1_i32_101 = arith.constant 1 : i32
    %278 = vector.broadcast %c1_i32_101 : i32 to vector<1x3xi32>
    %279 = arith.cmpi eq, %259, %278 : vector<1x3xi32>
    %280 = vector.extract_strided_slice %258 {offsets = [1, 1], sizes = [1, 1], strides = [1, 1]} : vector<3x3xf32> to vector<1x1xf32>
    %281 = vector.extract_strided_slice %258 {offsets = [2, 1], sizes = [1, 1], strides = [1, 1]} : vector<3x3xf32> to vector<1x1xf32>
    %282 = vector.shape_cast %280 : vector<1x1xf32> to vector<1x1xf32>
    %283 = vector.broadcast %282 : vector<1x1xf32> to vector<1x3xf32>
    %284 = vector.shape_cast %281 : vector<1x1xf32> to vector<1x1xf32>
    %285 = vector.broadcast %284 : vector<1x1xf32> to vector<1x3xf32>
    %286 = arith.select %279, %283, %285 : vector<1x3xi1>, vector<1x3xf32>
    %287 = vector.shape_cast %277 : vector<1x1xf32> to vector<1x1xf32>
    %288 = vector.broadcast %287 : vector<1x1xf32> to vector<1x3xf32>
    %289 = arith.select %276, %288, %286 : vector<1x3xi1>, vector<1x3xf32>
    %290 = vector.broadcast %274 : vector<1x3xf32> to vector<3x3xf32>
    %291 = arith.cmpf ogt, %82, %290 : vector<3x3xf32>
    %cst_102 = arith.constant 0.000000e+00 : f32
    %292 = vector.broadcast %cst_102 : f32 to vector<3x3xf32>
    %293 = arith.select %291, %82, %292 : vector<3x3xi1>, vector<3x3xf32>
    %cst_103 = arith.constant dense<0.000000e+00> : vector<3xf32>
    %294 = vector.multi_reduction <add>, %293, %cst_103 [1] : vector<3x3xf32> to vector<3xf32>
    %295 = vector.shape_cast %294 : vector<3xf32> to vector<3x1xf32>
    %cst_104 = arith.constant 0.333333343 : f32
    %296 = vector.broadcast %cst_104 : f32 to vector<3x1xf32>
    %297 = arith.mulf %295, %296 : vector<3x1xf32>
    %298 = vector.broadcast %289 : vector<1x3xf32> to vector<3x3xf32>
    %299 = arith.cmpf ogt, %90, %298 : vector<3x3xf32>
    %cst_105 = arith.constant 0.000000e+00 : f32
    %300 = vector.broadcast %cst_105 : f32 to vector<3x3xf32>
    %301 = arith.select %299, %90, %300 : vector<3x3xi1>, vector<3x3xf32>
    %cst_106 = arith.constant dense<0.000000e+00> : vector<3xf32>
    %302 = vector.multi_reduction <add>, %301, %cst_106 [1] : vector<3x3xf32> to vector<3xf32>
    %303 = vector.shape_cast %302 : vector<3xf32> to vector<3x1xf32>
    %cst_107 = arith.constant 0.333333343 : f32
    %304 = vector.broadcast %cst_107 : f32 to vector<3x1xf32>
    %305 = arith.mulf %303, %304 : vector<3x1xf32>
    %306 = vector.extract_strided_slice %258 {offsets = [0, 2], sizes = [3, 1], strides = [1, 1]} : vector<3x3xf32> to vector<3x1xf32>
    %307 = vector.broadcast %306 : vector<3x1xf32> to vector<3x32xf32>
    %308 = arith.cmpf ogt, %97, %307 : vector<3x32xf32>
    %cst_108 = arith.constant 0.000000e+00 : f32
    %309 = vector.broadcast %cst_108 : f32 to vector<3x32xf32>
    %310 = arith.select %308, %97, %309 : vector<3x32xi1>, vector<3x32xf32>
    %cst_109 = arith.constant 0.000000e+00 : f32
    %311 = vector.broadcast %cst_109 : f32 to vector<3x81xf32>
    %312 = tpu.concatenate %297, %305, %216, %310, %82, %90, %161, %258, %311 in 1 : vector<3x1xf32>, vector<3x1xf32>, vector<3x1xf32>, vector<3x32xf32>, vector<3x3xf32>, vector<3x3xf32>, vector<3x3xf32>, vector<3x3xf32>, vector<3x81xf32> -> vector<3x128xf32>
    %cst_110 = arith.constant 0.000000e+00 : f32
    %313 = vector.broadcast %cst_110 : f32 to vector<5x128xf32>
    %314 = tpu.concatenate %312, %313 in 0 : vector<3x128xf32>, vector<5x128xf32> -> vector<8x128xf32>
    %c0_111 = arith.constant 0 : index
    %c0_112 = arith.constant 0 : index
    %315 = vector.load %arg7[%c0_111, %c0_112] : memref<8x128xf32, #tpu.memory_space<vmem>>, vector<8x128xf32>
    tpu.vector_store %arg7[%c0_111, %c0_112], %314 {strides = array<i32>} : memref<8x128xf32, #tpu.memory_space<vmem>>, vector<8x128xf32>,
    return
  }
}

</mosaic_0001>

<bundles_post_ra>
// kernel: forward.1
= control target key start
LH: loop header
LB: loop body
LE: loop exit
PB: predicated region body
PF: predicated region fallthrough
CT: control target
= control target key end

     0   :  { %12 = vsyncpa [#allocation3], 0  ;;  %s2051_s0 = inlined_call_operand.vmem [shape: f32[3,16], index: 0, kind: input, shape index: {}]   ;;  %s2052_s1 = inlined_call_operand.vmem [shape: f32[16,544], index: 1, kind: input, shape index: {}]   ;;  %s2053_s2 = inlined_call_operand.hbm [shape: f32[512,256], index: 2, kind: input, shape index: {}]   ;;  %s2054_s3 = inlined_call_operand.vmem [shape: f32[256,38], index: 3, kind: input, shape index: {}]   ;;  %s2055_s4 = inlined_call_operand.vmem [shape: f32[32,768], index: 4, kind: input, shape index: {}]   ;;  %s2056_s5 = inlined_call_operand.hbm [shape: f32[1,4608], index: 5, kind: input, shape index: {}]   ;;  %s2057_s6 = inlined_call_operand.vmem [shape: f32[8,768], index: 6, kind: input, shape index: {}]   ;;  %s2058_s7 = inlined_call_operand.vmem [shape: f32[8,128], index: 7, kind: output, shape index: {}]  }
   0x1   :  { %s22_s26 = sshll.u32 %s2053_s2, 4  ;;  %s23_s26 = int_to_ptr.hbm [resolvable:$true] %s22_s26 }
   0x2   :  { %13 = vsyncpa [#allocation5], 0  ;;  %s1641_s27 = smov [#allocation2]   ;;  %s40_s8 = sshll.u32 %s2056_s5, 4  ;;  %s41_s8 = int_to_ptr.hbm [resolvable:$true] %s40_s8 }
   0x3   :  { %s24_s28 = sshll.u32 %s1641_s27, 4  ;;  %s1642_s9 = smov 256   ;;  %s25_s28 = int_to_ptr.vmem [resolvable:$true] %s24_s28 }
   0x4   :  { %s1643_s10 = smov 16   ;;  %s1644_s11 = smov [#allocation4]  }
   0x5   :  { %30 = dma.hbm_to_vmem [thread:$0]  %s23_s26, 16384, %s25_s28, [#allocation3], %s1642_s9, %s1642_s9, %s1643_s10  }
   0x6   :  { %s42_s12 = sshll.u32 %s1644_s11, 4  ;;  %s43_s12 = int_to_ptr.vmem [resolvable:$true] %s42_s12 }
   0x7   :  { %45 = dma.hbm_to_vmem [thread:$0]  %s41_s8, 576, %s43_s12, [#allocation5]  }
   0x8   :  { %1637 = dma.done.wait [#allocation3], 16384  }
   0x9   :  { %1638 = vsyncadd [#allocation3], 4294950912 }
   0xa   :  { %1639 = dma.done.wait [#allocation5], 576  }
   0xb   :  { %1640 = vsyncadd [#allocation5], 4294966720  ;;  %v69_v0 = vld [vmem:[%s2052_s1 + $0x30] sm:$0xff]  ;;  %v70_v1 = vld [vmem:[%s2052_s1 + $0x38] sm:$0xff]  ;;  %vm73_vm0 = vcmask 130048   ;;  %vm213_vm1 = vcmask 1042432  }
   0xc   :  { %v64_v2 = vld [vmem:[%s2052_s1 + $0x8] sm:$0xff]  ;;  %111 = vmatpush.msra.mxu1 %v69_v0  ;;  %131 = vmatpush.msra.mxu2 %v70_v1  ;;  %v65_v3 = vld [vmem:[%s2052_s1 + $0x10] sm:$0xff]  ;;  %v56_v4 = vld [vmem:[%s2051_s0] sm:$0x7]  ;;  %vm316_vm5 = vcmask 64512   ;;  %s1645_s8 = smov 122  }
   0xd   :  { %v71_v5 = vld [vmem:[%s2052_s1 + $0x40] sm:$0xff]  ;;  %v68_v6 = vld [vmem:[%s2052_s1 + $0x28] sm:$0xff]  ;;  %v66_v7 = vld [vmem:[%s2052_s1 + $0x18] sm:$0xff]  ;;  %vm1036_vm12 = vcmask 18432   ;;  %s1646_s9 = smov 125   ;;  %vm986_vm14 = vcmask 261120  }
   0xe   :  { %151 = vmatpush.msra.mxu3 %v71_v5  ;;  %v63_v8 = vld [vmem:[%s2052_s1] sm:$0xff]  ;;  %112 = vmatpush.msra.mxu1 %v64_v2  ;;  %v58_v9 = vld [vmem:[%s2057_s6 + $0x8] sm:$0xff]  ;;  %v59_v12 = vld [vmem:[%s2057_s6 + $0x10] sm:$0xff]  ;;  %s1649_s5 = smov 96   ;;  %s1654_s19 = smov 35  }
   0xf   :  { %132 = vmatpush.msra.mxu2 %v65_v3  ;;  %1498 = vmatmul.msk.f32.vlgmr.msra.gmra.mxu1 %vm73_vm0, %v56_v4  ;;  %v72_v10 = vld [vmem:[%s2052_s1 + $0x48] sm:$0xff]  ;;  %v67_v11 = vld [vmem:[%s2052_s1 + $0x20] sm:$0xff]  ;;  %v60_v14 = vld [vmem:[%s2057_s6 + $0x18] sm:$0xff]  ;;  %s1655_s20 = smov 41   ;;  %s1656_s21 = smov 44  }
  0x10   :  { %1499 = vmatmul.msk.f32.vlgmr.msra.gmra.mxu2 %vm73_vm0, %v56_v4  ;;  %91 = vmatpush.msra.mxu0 %v68_v6  ;;  %v57_v13 = vld [vmem:[%s2057_s6] sm:$0xff]  ;;  %v476_v52 = vld [vmem:[#allocation2 + $0xf0] sm:$0xff]  ;;  %s1657_s22 = smov 3  }
  0x11   :  { %152 = vmatpush.msra.mxu3 %v66_v7  ;;  %253 = vmatpush.xpose.msrb.mxu2 %v58_v9  ;;  %v177_v15 = vld [vmem:[#allocation4] sm:$0xf]  ;;  %v572_v53 = vld [vmem:[#allocation2 + $0x3f0] sm:$0xff] }
  0x12   :  { %1500 = vmatmul.msk.f32.vlgmr.msra.gmra.mxu3 %vm73_vm0, %v56_v4  ;;  %92 = vmatpush.msra.mxu0 %v63_v8  ;;  %v180_v16 = vperm.slane %v177_v15, 1  ;;  %v179_v19 = vperm.slane %v177_v15, 0  ;;  %v181_v21 = vperm.slane %v177_v15, 2  ;;  %v182_v25 = vperm.slane %v177_v15, 3  ;;  %v474_v54 = vld [vmem:[#allocation2 + $0xe0] sm:$0xff]  ;;  %v472_v56 = vld [vmem:[#allocation2 + $0xd0] sm:$0xff] }
  0x13   :  { %1497 = vmatmul.msk.f32.vlgmr.msra.gmra.mxu0 %vm73_vm0, %v56_v4  ;;  %273 = vmatpush.xpose.msrb.mxu3 %v59_v12  ;;  %v570_v55 = vld [vmem:[#allocation2 + $0x3e0] sm:$0xff]  ;;  %v568_v58 = vld [vmem:[#allocation2 + $0x3d0] sm:$0xff] }
  0x14   :  { %171 = vmatpush.msrb.mxu0 %v72_v10  ;;  %233 = vmatpush.xpose.msrb.mxu1 %v57_v13  ;;  %v508_v59 = vld [vmem:[#allocation2 + $0x1f0] sm:$0xff]  ;;  %v506_v61 = vld [vmem:[#allocation2 + $0x1e0] sm:$0xff] }
  0x15   :  { %355 = vmatpush.msra.mxu2 %v58_v9  ;;  %v540_v60 = vld [vmem:[#allocation2 + $0x2f0] sm:$0xff]  ;;  %v470_v63 = vld [vmem:[#allocation2 + $0xc0] sm:$0xff] }
  0x16   :  { %172 = vmatpush.msrb.mxu0 %v67_v11  ;;  %v566_v0 = vld [vmem:[#allocation2 + $0x3c0] sm:$0xff]  ;;  %v504_v2 = vld [vmem:[#allocation2 + $0x1d0] sm:$0xff] }
  0x17   :  { %375 = vmatpush.msra.mxu3 %v59_v12  ;;  %v538_v1 = vld [vmem:[#allocation2 + $0x2e0] sm:$0xff]  ;;  %v536_v3 = vld [vmem:[#allocation2 + $0x2d0] sm:$0xff] }
  0x18   :  { %335 = vmatpush.msra.mxu1 %v57_v13  ;;  %293 = vmatpush.xpose.msra.mxu0 %v60_v14  ;;  %v468_v5 = vld [vmem:[#allocation2 + $0xb0] sm:$0xff]  ;;  %v502_v7 = vld [vmem:[#allocation2 + $0x1c0] sm:$0xff] }
  0x19   :  { %v564_v6 = vld [vmem:[#allocation2 + $0x3b0] sm:$0xff]  ;;  %v534_v8 = vld [vmem:[#allocation2 + $0x2c0] sm:$0xff] }
  0x1a   :  { %v466_v10 = vld [vmem:[#allocation2 + $0xa0] sm:$0xff]  ;;  %v500_v12 = vld [vmem:[#allocation2 + $0x1b0] sm:$0xff] }
  0x1b   :  { %1501 = vmatmul.msk.f32.vlgmr.msrb.gmra.mxu0 %vm73_vm0, %v56_v4  ;;  %v562_v11 = vld [vmem:[#allocation2 + $0x3a0] sm:$0xff]  ;;  %v532_v13 = vld [vmem:[#allocation2 + $0x2b0] sm:$0xff]  ;;  %vm1076_vm0 = vcmask 256000  }
  0x1c   :  { %395 = vmatpush.msrb.mxu0 %v60_v14  ;;  %v464_v15 = vld [vmem:[#allocation2 + $0x90] sm:$0xff] }
  0x8c   :  { %v114_v17 = vpop.f32.mrf.mxu1 }
  0x8d   :  { %v188_v18 = vadd.f32 %v180_v16, %v114_v17  ;;  %v560_v16 = vld [vmem:[#allocation2 + $0x390] sm:$0xff]  ;;  %v498_v17 = vld [vmem:[#allocation2 + $0x1a0] sm:$0xff] }
  0x8f   :  { %v1754_v20 = vmax.f32 %v188_v18, 0.0  ;;  %v530_v18 = vld [vmem:[#allocation2 + $0x2a0] sm:$0xff] }
  0x90   :  { %v94_v22 = vpop.f32.mrf.mxu0 }
  0x91   :  { %v198_v23 = vmul.f32 %v1754_v20, %v1754_v20  ;;  %v187_v24 = vadd.f32 %v179_v19, %v94_v22  ;;  %v462_v19 = vld [vmem:[#allocation2 + $0x80] sm:$0xff]  ;;  %v496_v22 = vld [vmem:[#allocation2 + $0x190] sm:$0xff] }
  0x93   :  { %v134_v26 = vpop.f32.mrf.mxu2  ;;  %v206_v27 = vrot.slane %v198_v23, 5  ;;  %v1758_v28 = vmax.f32 %v187_v24, 0.0  ;;  %v528_v23 = vld [vmem:[#allocation2 + $0x290] sm:$0xff] }
  0x94   :  { %v189_v29 = vadd.f32 %v181_v21, %v134_v26  ;;  %v558_v21 = vld [vmem:[#allocation2 + $0x380] sm:$0xff]  ;;  %v460_v24 = vld [vmem:[#allocation2 + $0x70] sm:$0xff] }
  0x95   :  { %v154_v30 = vpop.f32.mrf.mxu3  ;;  %v197_v31 = vmul.f32 %v1758_v28, %v1758_v28  ;;  %v215_v34 = vsel %vm213_vm1, %v1754_v20, %v206_v27  ;;  %v494_v26 = vld [vmem:[#allocation2 + $0x180] sm:$0xff] }
  0x96   :  { %v1762_v32 = vmax.f32 %v189_v29, 0.0  ;;  %v190_v33 = vadd.f32 %v182_v25, %v154_v30  ;;  %254 = vmatmul.f32.vlgmr.msrb.gmra.mxu2 %v215_v34  ;;  %v556_v25 = vld [vmem:[#allocation2 + $0x370] sm:$0xff]  ;;  %v526_v27 = vld [vmem:[#allocation2 + $0x280] sm:$0xff] }
  0x97   :  { %v205_v35 = vrot.slane %v197_v31, 5  ;;  %600 = vmatpush.msrb.mxu2 %v508_v59  ;;  %v458_v29 = vld [vmem:[#allocation2 + $0x60] sm:$0xff]  ;;  %v492_v31 = vld [vmem:[#allocation2 + $0x170] sm:$0xff] }
  0x98   :  { %v199_v36 = vmul.f32 %v1762_v32, %v1762_v32  ;;  %v1768_v37 = vmax.f32 %v190_v33, 0.0  ;;  %v1778_v44 = vpop.f32.mrf.mxu0  ;;  %v554_v30 = vld [vmem:[#allocation2 + $0x360] sm:$0xff]  ;;  %v524_v33 = vld [vmem:[#allocation2 + $0x270] sm:$0xff] }
  0x99   :  { %v214_v40 = vsel %vm213_vm1, %v1758_v28, %v205_v35  ;;  %601 = vmatpush.msrb.mxu2 %v506_v61  ;;  %v456_v35 = vld [vmem:[#allocation2 + $0x50] sm:$0xff]  ;;  %v482_v61 = vld [vmem:[#allocation2 + $0x120] sm:$0xff] }
  0x9a   :  { %v207_v38 = vrot.slane %v199_v36, 5  ;;  %v200_v39 = vmul.f32 %v1768_v37, %v1768_v37  ;;  %234 = vmatmul.f32.vlgmr.msrb.gmra.mxu1 %v214_v40  ;;  %v552_v36 = vld [vmem:[#allocation2 + $0x350] sm:$0xff]  ;;  %v522_v40 = vld [vmem:[#allocation2 + $0x260] sm:$0xff] }
  0x9b   :  { %580 = vmatpush.msrb.mxu1 %v476_v52  ;;  %602 = vmatpush.msrb.mxu2 %v504_v2  ;;  %v450_v52 = vld [vmem:[#allocation2 + $0x20] sm:$0xff]  ;;  %v544_v59 = vld [vmem:[#allocation2 + $0x310] sm:$0xff] }
  0x9c   :  { %v208_v41 = vrot.slane %v200_v39, 5  ;;  %v216_v42 = vsel %vm213_vm1, %v1762_v32, %v207_v38  ;;  %v490_v39 = vld [vmem:[#allocation2 + $0x160] sm:$0xff] }
  0x9d   :  { %274 = vmatmul.f32.vlgmr.msrb.gmra.mxu3 %v216_v42  ;;  %581 = vmatpush.msrb.mxu1 %v474_v54  ;;  %v550_v42 = vld [vmem:[#allocation2 + $0x340] sm:$0xff] }
  0x9e   :  { %v217_v43 = vsel %vm213_vm1, %v1768_v37, %v208_v41  ;;  %620 = vmatpush.msrb.mxu3 %v540_v60  ;;  %603 = vmatpush.msrb.mxu2 %v502_v7  ;;  %v454_v41 = vld [vmem:[#allocation2 + $0x40] sm:$0xff]  ;;  %v475_v7 = vld [vmem:[#allocation2 + $0xe8] sm:$0xff] }
  0x9f   :  { %294 = vmatmul.f32.vlgmr.msra.gmra.mxu0 %v217_v43  ;;  %582 = vmatpush.msrb.mxu1 %v472_v56  ;;  %v516_v56 = vld [vmem:[#allocation2 + $0x230] sm:$0xff]  ;;  %v542_v2 = vld [vmem:[#allocation2 + $0x300] sm:$0xff] }
  0xa0   :  { %640 = vmatpush.msra.mxu0 %v572_v53  ;;  %621 = vmatpush.msrb.mxu3 %v538_v1  ;;  %v546_v53 = vld [vmem:[#allocation2 + $0x320] sm:$0xff] }
  0xa1   :  { %583 = vmatpush.msrb.mxu1 %v470_v63  ;;  %604 = vmatpush.msrb.mxu2 %v500_v12  ;;  %v446_v1 = vld [vmem:[#allocation2] sm:$0xff]  ;;  %v509_v12 = vld [vmem:[#allocation2 + $0x1f8] sm:$0xff] }
  0xa2   :  { %641 = vmatpush.msra.mxu0 %v570_v55  ;;  %622 = vmatpush.msrb.mxu3 %v536_v3  ;;  %v484_v55 = vld [vmem:[#allocation2 + $0x130] sm:$0xff]  ;;  %v477_v3 = vld [vmem:[#allocation2 + $0xf8] sm:$0xff] }
  0xa3   :  { %584 = vmatpush.msrb.mxu1 %v468_v5  ;;  %605 = vmatpush.msrb.mxu2 %v498_v17  ;;  %v480_v5 = vld [vmem:[#allocation2 + $0x110] sm:$0xff]  ;;  %v539_v17 = vld [vmem:[#allocation2 + $0x2e8] sm:$0xff] }
  0xa4   :  { %642 = vmatpush.msra.mxu0 %v568_v58  ;;  %623 = vmatpush.msrb.mxu3 %v534_v8  ;;  %v448_v58 = vld [vmem:[#allocation2 + $0x10] sm:$0xff]  ;;  %v478_v8 = vld [vmem:[#allocation2 + $0x100] sm:$0xff] }
  0xa5   :  { %585 = vmatpush.msrb.mxu1 %v466_v10  ;;  %606 = vmatpush.msrb.mxu2 %v496_v22  ;;  %v473_v10 = vld [vmem:[#allocation2 + $0xd8] sm:$0xff] }
  0xa6   :  { %643 = vmatpush.msra.mxu0 %v566_v0  ;;  %624 = vmatpush.msrb.mxu3 %v532_v13  ;;  %v541_v13 = vld [vmem:[#allocation2 + $0x2f8] sm:$0xff] }
  0xa7   :  { %586 = vmatpush.msrb.mxu1 %v464_v15  ;;  %607 = vmatpush.msrb.mxu2 %v494_v26  ;;  %v567_v15 = vld [vmem:[#allocation2 + $0x3c8] sm:$0xff]  ;;  %v537_v22 = vld [vmem:[#allocation2 + $0x2d8] sm:$0xff] }
  0xa8   :  { %644 = vmatpush.msra.mxu0 %v564_v6  ;;  %625 = vmatpush.msrb.mxu3 %v530_v18  ;;  %v512_v6 = vld [vmem:[#allocation2 + $0x210] sm:$0xff]  ;;  %v469_v18 = vld [vmem:[#allocation2 + $0xb8] sm:$0xff]  ;;  %v535_v26 = vld [vmem:[#allocation2 + $0x2c8] sm:$0xff] }
  0xa9   :  { %587 = vmatpush.msrb.mxu1 %v462_v19  ;;  %608 = vmatpush.msrb.mxu2 %v492_v31  ;;  %v565_v19 = vld [vmem:[#allocation2 + $0x3b8] sm:$0xff] }
  0xaa   :  { %645 = vmatpush.msra.mxu0 %v562_v11  ;;  %626 = vmatpush.msrb.mxu3 %v528_v23  ;;  %v569_v11 = vld [vmem:[#allocation2 + $0x3d8] sm:$0xff]  ;;  %v467_v23 = vld [vmem:[#allocation2 + $0xa8] sm:$0xff] }
  0xab   :  { %588 = vmatpush.msrb.mxu1 %v460_v24  ;;  %609 = vmatpush.msrb.mxu2 %v490_v39  ;;  %v563_v24 = vld [vmem:[#allocation2 + $0x3a8] sm:$0xff]  ;;  %v501_v31 = vld [vmem:[#allocation2 + $0x1b8] sm:$0xff] }
  0xac   :  { %646 = vmatpush.msra.mxu0 %v560_v16  ;;  %627 = vmatpush.msrb.mxu3 %v526_v27  ;;  %v507_v16 = vld [vmem:[#allocation2 + $0x1e8] sm:$0xff]  ;;  %v465_v27 = vld [vmem:[#allocation2 + $0x98] sm:$0xff] }
  0xad   :  { %589 = vmatpush.msrb.mxu1 %v458_v29  ;;  %v561_v29 = vld [vmem:[#allocation2 + $0x398] sm:$0xff] }
  0xae   :  { %647 = vmatpush.msra.mxu0 %v558_v21  ;;  %628 = vmatpush.msrb.mxu3 %v524_v33  ;;  %v505_v21 = vld [vmem:[#allocation2 + $0x1d8] sm:$0xff] }
  0xaf   :  { %590 = vmatpush.msrb.mxu1 %v456_v35  ;;  %v533_v33 = vld [vmem:[#allocation2 + $0x2b8] sm:$0xff] }
  0xb0   :  { %648 = vmatpush.msra.mxu0 %v556_v25  ;;  %629 = vmatpush.msrb.mxu3 %v522_v40  ;;  %v503_v25 = vld [vmem:[#allocation2 + $0x1c8] sm:$0xff]  ;;  %v461_v35 = vld [vmem:[#allocation2 + $0x78] sm:$0xff] }
  0xb1   :  { %591 = vmatpush.msrb.mxu1 %v454_v41  ;;  %v557_v39 = vld [vmem:[#allocation2 + $0x378] sm:$0xff]  ;;  %v459_v40 = vld [vmem:[#allocation2 + $0x68] sm:$0xff] }
  0xb2   :  { %649 = vmatpush.msra.mxu0 %v554_v30  ;;  %v463_v30 = vld [vmem:[#allocation2 + $0x88] sm:$0xff]  ;;  %v497_v41 = vld [vmem:[#allocation2 + $0x198] sm:$0xff] }
  0xb4   :  { %650 = vmatpush.msra.mxu0 %v552_v36  ;;  %v499_v36 = vld [vmem:[#allocation2 + $0x1a8] sm:$0xff] }
  0xb6   :  { %651 = vmatpush.msra.mxu0 %v550_v42  ;;  %v529_v42 = vld [vmem:[#allocation2 + $0x298] sm:$0xff] }
 0x117   :  { %v235_v45 = vpop.f32.mrf.mxu1 }
 0x119   :  { %v255_v46 = vpop.f32.mrf.mxu2 }
 0x11a   :  { %v256_v47 = vadd.f32 %v255_v46, %v235_v45  ;;  %v488_v45 = vld [vmem:[#allocation2 + $0x150] sm:$0xff] }
 0x11b   :  { %v520_v46 = vld [vmem:[#allocation2 + $0x250] sm:$0xff]  ;;  %610 = vmatpush.msrb.mxu2 %v488_v45  ;;  %v457_v45 = vld [vmem:[#allocation2 + $0x58] sm:$0xff] }
 0x11c   :  { %v295_v50 = vpop.f32.mrf.mxu0  ;;  %630 = vmatpush.msrb.mxu3 %v520_v46  ;;  %v495_v46 = vld [vmem:[#allocation2 + $0x188] sm:$0xff] }
 0x120   :  { %v275_v48 = vpop.f32.mrf.mxu3 }
 0x121   :  { %v276_v49 = vadd.f32 %v275_v48, %v256_v47  ;;  %v452_v47 = vld [vmem:[#allocation2 + $0x30] sm:$0xff] }
 0x122   :  { %v548_v48 = vld [vmem:[#allocation2 + $0x330] sm:$0xff]  ;;  %592 = vmatpush.msrb.mxu1 %v452_v47  ;;  %v527_v47 = vld [vmem:[#allocation2 + $0x288] sm:$0xff] }
 0x123   :  { %v296_v51 = vadd.f32 %v295_v50, %v276_v49  ;;  %v486_v50 = vld [vmem:[#allocation2 + $0x140] sm:$0xff]  ;;  %652 = vmatpush.msra.mxu0 %v548_v48  ;;  %v553_v48 = vld [vmem:[#allocation2 + $0x358] sm:$0xff] }
 0x124   :  { %611 = vmatpush.msrb.mxu2 %v486_v50  ;;  %593 = vmatpush.msrb.mxu1 %v450_v52  ;;  %v493_v50 = vld [vmem:[#allocation2 + $0x178] sm:$0xff]  ;;  %v551_v52 = vld [vmem:[#allocation2 + $0x348] sm:$0xff] }
 0x125   :  { %v1780_v57 = vmul.f32 0.015625, %v296_v51  ;;  %v518_v51 = vld [vmem:[#allocation2 + $0x240] sm:$0xff]  ;;  %653 = vmatpush.msra.mxu0 %v546_v53  ;;  %v453_v53 = vld [vmem:[#allocation2 + $0x38] sm:$0xff] }
 0x126   :  { %631 = vmatpush.msrb.mxu3 %v518_v51  ;;  %612 = vmatpush.msrb.mxu2 %v484_v55  ;;  %v525_v51 = vld [vmem:[#allocation2 + $0x278] sm:$0xff]  ;;  %v523_v55 = vld [vmem:[#allocation2 + $0x268] sm:$0xff] }
 0x127   :  { %v299_v62 = vmul.f32 %v1780_v57, %v1780_v57  ;;  %594 = vmatpush.msrb.mxu1 %v448_v58  ;;  %654 = vmatpush.msra.mxu0 %v544_v59  ;;  %v451_v58 = vld [vmem:[#allocation2 + $0x28] sm:$0xff]  ;;  %v489_v59 = vld [vmem:[#allocation2 + $0x158] sm:$0xff] }
 0x128   :  { %632 = vmatpush.msrb.mxu3 %v516_v56  ;;  %613 = vmatpush.msrb.mxu2 %v482_v61  ;;  %v549_v56 = vld [vmem:[#allocation2 + $0x338] sm:$0xff]  ;;  %v547_v61 = vld [vmem:[#allocation2 + $0x328] sm:$0xff] }
 0x129   :  { %v301_v4 = vrot.slane %v299_v62, 5  ;;  %v514_v62 = vld [vmem:[#allocation2 + $0x220] sm:$0xff]  ;;  %595 = vmatpush.msrb.mxu1 %v446_v1  ;;  %655 = vmatpush.msra.mxu0 %v542_v2  ;;  %v545_v1 = vld [vmem:[#allocation2 + $0x318] sm:$0xff]  ;;  %v447_v2 = vld [vmem:[#allocation2 + $0x8] sm:$0xff] }
 0x12a   :  { %633 = vmatpush.msrb.mxu3 %v514_v62  ;;  %614 = vmatpush.msrb.mxu2 %v480_v5  ;;  %v449_v62 = vld [vmem:[#allocation2 + $0x18] sm:$0xff]  ;;  %v543_v5 = vld [vmem:[#allocation2 + $0x308] sm:$0xff] }
 0x12b   :  { %v303_v9 = vsub.f32 %v1780_v57, %v301_v4  ;;  %v573_v4 = vld [vmem:[#allocation2 + $0x3f8] sm:$0xff] }
 0x12c   :  { %634 = vmatpush.msrb.mxu3 %v512_v6  ;;  %615 = vmatpush.msrb.mxu2 %v478_v8  ;;  %v483_v6 = vld [vmem:[#allocation2 + $0x128] sm:$0xff]  ;;  %v513_v8 = vld [vmem:[#allocation2 + $0x218] sm:$0xff] }
 0x12d   :  { %v1785_v14 = vadd.f32 1e-05, %v303_v9  ;;  %v510_v9 = vld [vmem:[#allocation2 + $0x200] sm:$0xff] }
 0x12e   :  { %635 = vmatpush.msrb.mxu3 %v510_v9  ;;  %v479_v9 = vld [vmem:[#allocation2 + $0x108] sm:$0xff] }
 0x12f   :  { %1557 = vrsqrt.f32 %v1785_v14  ;;  %vm311_vm3 = vweird.f32 %v1785_v14 }
 0x135   :  { %v1558_v34 = vpop.eup %1557 }
 0x136   :  { %v306_v38 = vmul.f32 %v1558_v34, %v1785_v14  ;;  %vm312_vm2 = vweird.f32 %v1558_v34  ;;  %v471_v14 = vld [vmem:[#allocation2 + $0xc8] sm:$0xff] }
 0x137   :  { %vm313_vm4 = vmor %vm311_vm3, %vm312_vm2 }
 0x138   :  { %v307_v43 = vmul.f32 %v1558_v34, %v306_v38  ;;  %v531_v38 = vld [vmem:[#allocation2 + $0x2a8] sm:$0xff] }
 0x13a   :  { %v308_v49 = vmul.f32 0.5, %v307_v43  ;;  %v555_v43 = vld [vmem:[#allocation2 + $0x368] sm:$0xff] }
 0x13c   :  { %v309_v54 = vsub.f32 1.5, %v308_v49  ;;  %v455_v49 = vld [vmem:[#allocation2 + $0x48] sm:$0xff] }
 0x13e   :  { %v310_v60 = vmul.f32 %v1558_v34, %v309_v54  ;;  %v491_v54 = vld [vmem:[#allocation2 + $0x168] sm:$0xff] }
 0x140   :  { %v314_v63 = vsel %vm313_vm4, %v1558_v34, %v310_v60  ;;  %v559_v34 = vld [vmem:[#allocation2 + $0x388] sm:$0xff]  ;;  %v521_v60 = vld [vmem:[#allocation2 + $0x258] sm:$0xff] }
 0x141   :  { %v315_v0 = vsel %vm213_vm1, %v1780_v57, %v314_v63  ;;  %v571_v57 = vld [vmem:[#allocation2 + $0x3e8] sm:$0xff] }
 0x142   :  { %1502 = vmatmul.msk.f32.vlgmr.msra.gmra.mxu1 %vm316_vm5, %v315_v0  ;;  %1503 = vmatmul.msk.f32.vlgmr.msra.gmra.mxu2 %vm316_vm5, %v315_v0  ;;  %v487_v63 = vld [vmem:[#allocation2 + $0x148] sm:$0xff] }
 0x143   :  { %1504 = vmatmul.msk.f32.vlgmr.msra.gmra.mxu3 %vm316_vm5, %v315_v0  ;;  %1505 = vmatmul.msk.f32.vlgmr.msrb.gmra.mxu0 %vm316_vm5, %v315_v0  ;;  %v519_v0 = vld [vmem:[#allocation2 + $0x248] sm:$0xff] }
 0x144   :  { %660 = vmatpush.msra.mxu1 %v477_v3  ;;  %720 = vmatpush.msrb.mxu0 %v573_v4  ;;  %v485_v3 = vld [vmem:[#allocation2 + $0x138] sm:$0xff] }
 0x145   :  { %680 = vmatpush.msra.mxu2 %v509_v12  ;;  %700 = vmatpush.msra.mxu3 %v541_v13  ;;  %v517_v4 = vld [vmem:[#allocation2 + $0x238] sm:$0xff]  ;;  %v196_v13 = vld [vmem:[#allocation4 + $0x8] sm:$0xf] }
 0x146   :  { %661 = vmatpush.msra.mxu1 %v475_v7  ;;  %721 = vmatpush.msrb.mxu0 %v571_v57  ;;  %v515_v7 = vld [vmem:[#allocation2 + $0x228] sm:$0xff]  ;;  %v481_v57 = vld [vmem:[#allocation2 + $0x118] sm:$0xff] }
 0x147   :  { %681 = vmatpush.msra.mxu2 %v507_v16  ;;  %701 = vmatpush.msra.mxu3 %v539_v17 }
 0x148   :  { %662 = vmatpush.msra.mxu1 %v473_v10  ;;  %722 = vmatpush.msrb.mxu0 %v569_v11  ;;  %v511_v10 = vld [vmem:[#allocation2 + $0x208] sm:$0xff]  ;;  %v195_v11 = vld [vmem:[#allocation4 + $0x4] sm:$0xf] }
 0x149   :  { %682 = vmatpush.msra.mxu2 %v505_v21  ;;  %702 = vmatpush.msra.mxu3 %v537_v22  ;;  %v421_v16 = vperm.slane %v195_v11, 0  ;;  %v424_v21 = vperm.slane %v195_v11, 3 }
 0x14a   :  { %663 = vmatpush.msra.mxu1 %v471_v14  ;;  %723 = vmatpush.msrb.mxu0 %v567_v15 }
 0x14b   :  { %683 = vmatpush.msra.mxu2 %v503_v25  ;;  %703 = vmatpush.msra.mxu3 %v535_v26  ;;  %v437_v25 = vperm.slane %v196_v13, 3 }
 0x14c   :  { %664 = vmatpush.msra.mxu1 %v469_v18  ;;  %724 = vmatpush.msrb.mxu0 %v565_v19 }
 0x14d   :  { %684 = vmatpush.msra.mxu2 %v501_v31  ;;  %704 = vmatpush.msra.mxu3 %v533_v33  ;;  %v422_v33 = vperm.slane %v195_v11, 1 }
 0x14e   :  { %665 = vmatpush.msra.mxu1 %v467_v23  ;;  %725 = vmatpush.msrb.mxu0 %v563_v24  ;;  %v434_v23 = vperm.slane %v196_v13, 0 }
 0x14f   :  { %685 = vmatpush.msra.mxu2 %v499_v36  ;;  %705 = vmatpush.msra.mxu3 %v531_v38  ;;  %v423_v38 = vperm.slane %v195_v11, 2 }
 0x150   :  { %666 = vmatpush.msra.mxu1 %v465_v27  ;;  %726 = vmatpush.msrb.mxu0 %v561_v29 }
 0x151   :  { %686 = vmatpush.msra.mxu2 %v497_v41  ;;  %706 = vmatpush.msra.mxu3 %v529_v42  ;;  %v436_v42 = vperm.slane %v196_v13, 2 }
 0x152   :  { %667 = vmatpush.msra.mxu1 %v463_v30  ;;  %727 = vmatpush.msrb.mxu0 %v559_v34 }
 0x153   :  { %687 = vmatpush.msra.mxu2 %v495_v46  ;;  %707 = vmatpush.msra.mxu3 %v527_v47 }
 0x154   :  { %668 = vmatpush.msra.mxu1 %v461_v35  ;;  %728 = vmatpush.msrb.mxu0 %v557_v39 }
 0x155   :  { %688 = vmatpush.msra.mxu2 %v493_v50  ;;  %708 = vmatpush.msra.mxu3 %v525_v51 }
 0x156   :  { %669 = vmatpush.msra.mxu1 %v459_v40  ;;  %729 = vmatpush.msrb.mxu0 %v555_v43  ;;  %v435_v40 = vperm.slane %v196_v13, 1  ;;  %v910_v13 = vld [vmem:[%s2054_s3 + $0xf8] sm:$0xff] }
 0x157   :  { %689 = vmatpush.msra.mxu2 %v491_v54  ;;  %709 = vmatpush.msra.mxu3 %v523_v55 }
 0x158   :  { %670 = vmatpush.msra.mxu1 %v457_v45  ;;  %730 = vmatpush.msrb.mxu0 %v553_v48  ;;  %v574_v48 = vld [vmem:[#allocation4 + $0xc] sm:$0x3] }
 0x159   :  { %690 = vmatpush.msra.mxu2 %v489_v59  ;;  %710 = vmatpush.msra.mxu3 %v521_v60  ;;  %v576_v50 = vperm.slane %v574_v48, 0 }
 0x15a   :  { %671 = vmatpush.msra.mxu1 %v455_v49  ;;  %731 = vmatpush.msrb.mxu0 %v551_v52 }
 0x15b   :  { %691 = vmatpush.msra.mxu2 %v487_v63  ;;  %711 = vmatpush.msra.mxu3 %v519_v0 }
 0x15c   :  { %672 = vmatpush.msra.mxu1 %v453_v53  ;;  %732 = vmatpush.msrb.mxu0 %v549_v56  ;;  %v577_v56 = vperm.slane %v574_v48, 1  ;;  %v899_v48 = vld [vmem:[%s2054_s3 + $0xa0] sm:$0xff] }
 0x15d   :  { %692 = vmatpush.msra.mxu2 %v485_v3  ;;  %712 = vmatpush.msra.mxu3 %v517_v4 }
 0x15e   :  { %673 = vmatpush.msra.mxu1 %v451_v58  ;;  %733 = vmatpush.msrb.mxu0 %v547_v61 }
 0x15f   :  { %693 = vmatpush.msra.mxu2 %v483_v6  ;;  %713 = vmatpush.msra.mxu3 %v515_v7 }
 0x160   :  { %674 = vmatpush.msra.mxu1 %v449_v62  ;;  %734 = vmatpush.msrb.mxu0 %v545_v1 }
 0x161   :  { %694 = vmatpush.msra.mxu2 %v481_v57  ;;  %714 = vmatpush.msra.mxu3 %v513_v8 }
 0x162   :  { %675 = vmatpush.msra.mxu1 %v447_v2  ;;  %735 = vmatpush.msrb.mxu0 %v543_v5 }
 0x163   :  { %695 = vmatpush.msra.mxu2 %v479_v9  ;;  %715 = vmatpush.msra.mxu3 %v511_v10 }
 0x1bf   :  { %v337_v12 = vpop.f32.mrf.mxu1 }
 0x1c0   :  { %v400_v14 = vsub.f32 %v1758_v28, %v337_v12  ;;  %v408_v15 = vrot.slane %v337_v12, 3  ;;  %v397_v17 = vpop.f32.mrf.mxu0 }
 0x1c1   :  { %v403_v18 = vsub.f32 %v1768_v37, %v397_v17  ;;  %v411_v19 = vrot.slane %v397_v17, 3  ;;  %v893_v17 = vld [vmem:[%s2054_s3 + $0x70] sm:$0xff] }
 0x1c2   :  { %v416_v22 = vmul.f32 %v408_v15, %v400_v14  ;;  %v909_v14 = vld [vmem:[%s2054_s3 + $0xf0] sm:$0xff] }
 0x1c3   :  { %v419_v24 = vmul.f32 %v411_v19, %v403_v18  ;;  %v908_v18 = vld [vmem:[%s2054_s3 + $0xe8] sm:$0xff] }
 0x1c4   :  { %v429_v26 = vmul.f32 %v421_v16, %v416_v22  ;;  %v894_v16 = vld [vmem:[%s2054_s3 + $0x78] sm:$0xff]  ;;  %v907_v22 = vld [vmem:[%s2054_s3 + $0xe0] sm:$0xff] }
 0x1c5   :  { %v432_v27 = vmul.f32 %v424_v21, %v419_v24  ;;  %v357_v29 = vpop.f32.mrf.mxu2  ;;  %v892_v21 = vld [vmem:[%s2054_s3 + $0x68] sm:$0xff]  ;;  %v891_v24 = vld [vmem:[%s2054_s3 + $0x60] sm:$0xff] }
 0x1c6   :  { %v401_v30 = vsub.f32 %v1754_v20, %v357_v29  ;;  %v409_v31 = vrot.slane %v357_v29, 3  ;;  %v377_v34 = vpop.f32.mrf.mxu3  ;;  %v442_v28 = vadd.f32 %v434_v23, %v429_v26  ;;  %v61_v20 = vld [vmem:[%s2057_s6 + $0x20] sm:$0xff]  ;;  %v905_v29 = vld [vmem:[%s2054_s3 + $0xd0] sm:$0xff] }
 0x1c7   :  { %v402_v35 = vsub.f32 %v1762_v32, %v377_v34  ;;  %v410_v36 = vrot.slane %v377_v34, 3  ;;  %v445_v37 = vadd.f32 %v437_v25, %v432_v27  ;;  %v62_v32 = vld [vmem:[%s2057_s6 + $0x28] sm:$0xff]  ;;  %v906_v25 = vld [vmem:[%s2054_s3 + $0xd8] sm:$0xff] }
 0x1c8   :  { %v417_v39 = vmul.f32 %v409_v31, %v401_v30  ;;  %596 = vmatmul.f32.vlgmr.msrb.gmra.mxu1 %v442_v28  ;;  %v890_v27 = vld [vmem:[%s2054_s3 + $0x58] sm:$0xff]  ;;  %v889_v31 = vld [vmem:[%s2054_s3 + $0x50] sm:$0xff] }
 0x1c9   :  { %v418_v41 = vmul.f32 %v410_v36, %v402_v35  ;;  %656 = vmatmul.f32.vlgmr.msra.gmra.mxu0 %v445_v37  ;;  %769 = vmatpush.xpose.msrb.mxu1 %v61_v20  ;;  %v903_v35 = vld [vmem:[%s2054_s3 + $0xc0] sm:$0xff] }
 0x1ca   :  { %v430_v43 = vmul.f32 %v422_v33, %v417_v39  ;;  %850 = vmatpush.msra.mxu0 %v62_v32  ;;  %v904_v33 = vld [vmem:[%s2054_s3 + $0xc8] sm:$0xff]  ;;  %v887_v36 = vld [vmem:[%s2054_s3 + $0x40] sm:$0xff] }
 0x1cb   :  { %v431_v45 = vmul.f32 %v423_v38, %v418_v41  ;;  %v902_v38 = vld [vmem:[%s2054_s3 + $0xb8] sm:$0xff]  ;;  %v900_v39 = vld [vmem:[%s2054_s3 + $0xa8] sm:$0xff] }
 0x1cc   :  { %v443_v46 = vadd.f32 %v435_v40, %v430_v43 }
 0x1cd   :  { %v444_v47 = vadd.f32 %v436_v42, %v431_v45 }
 0x1ce   :  { %616 = vmatmul.f32.vlgmr.msrb.gmra.mxu2 %v443_v46 }
 0x1cf   :  { %636 = vmatmul.f32.vlgmr.msrb.gmra.mxu3 %v444_v47  ;;  %789 = vmatpush.xpose.msrb.mxu2 %v62_v32  ;;  %v886_v32 = vld [vmem:[%s2054_s3 + $0x38] sm:$0xff] }
 0x1d0   :  { %676 = vmatmul.f32.vlgmr.msra.gmra.mxu1 %v442_v28  ;;  %830 = vmatpush.msrb.mxu3 %v61_v20  ;;  %v888_v28 = vld [vmem:[%s2054_s3 + $0x48] sm:$0xff] }
 0x1d1   :  { %736 = vmatmul.f32.vlgmr.msrb.gmra.mxu0 %v445_v37  ;;  %915 = vmatpush.msra.mxu1 %v894_v16  ;;  %v901_v37 = vld [vmem:[%s2054_s3 + $0xb0] sm:$0xff] }
 0x1d2   :  { %v1540_v16 = vld [vmem:[#allocation4 + $0x12] ss:$0 sm:$0xff] }
 0x1d3   :  { %916 = vmatpush.msra.mxu1 %v893_v17 }
 0x1d5   :  { %917 = vmatpush.msra.mxu1 %v892_v21  ;;  %v978_v21 = vld [vmem:[%s2055_s4 + $0x90] sm:$0xff] }
 0x1d6   :  { %696 = vmatmul.f32.vlgmr.msra.gmra.mxu2 %v443_v46 }
 0x1d7   :  { %716 = vmatmul.f32.vlgmr.msra.gmra.mxu3 %v444_v47  ;;  %935 = vmatpush.msra.mxu2 %v910_v13 }
 0x1d8   :  { %918 = vmatpush.msra.mxu1 %v891_v24  ;;  %1001 = vmatpush.msra.mxu3 %v978_v21 }
 0x1d9   :  { %936 = vmatpush.msra.mxu2 %v909_v14 }
 0x1da   :  { %919 = vmatpush.msra.mxu1 %v890_v27 }
 0x1db   :  { %937 = vmatpush.msra.mxu2 %v908_v18 }
 0x1dc   :  { %920 = vmatpush.msra.mxu1 %v889_v31 }
 0x1dd   :  { %938 = vmatpush.msra.mxu2 %v907_v22 }
 0x1de   :  { %921 = vmatpush.msra.mxu1 %v888_v28 }
 0x1df   :  { %939 = vmatpush.msra.mxu2 %v906_v25  ;;  %v975_v25 = vld [vmem:[%s2055_s4] sm:$0xff] }
 0x1e0   :  { %922 = vmatpush.msra.mxu1 %v887_v36 }
 0x1e1   :  { %940 = vmatpush.msra.mxu2 %v905_v29 }
 0x1e2   :  { %923 = vmatpush.msra.mxu1 %v886_v32  ;;  %v1647_v32 = vmov 3.0  }
 0x1e3   :  { %941 = vmatpush.msra.mxu2 %v904_v33 }
 0x1e5   :  { %942 = vmatpush.msra.mxu2 %v903_v35 }
 0x1e7   :  { %943 = vmatpush.msra.mxu2 %v902_v38 }
 0x1e9   :  { %944 = vmatpush.msra.mxu2 %v901_v37 }
 0x1eb   :  { %945 = vmatpush.msra.mxu2 %v900_v39 }
 0x1ed   :  { %946 = vmatpush.msra.mxu2 %v899_v48 }
 0x245   :  { %v597_v49 = vpop.f32.mrf.mxu1 }
 0x246   :  { %v598_v51 = vadd.f32 %v597_v49, %v576_v50  ;;  %v657_v55 = vpop.f32.mrf.mxu0  ;;  %v885_v49 = vld [vmem:[%s2054_s3 + $0x30] sm:$0xff]  ;;  %v898_v50 = vld [vmem:[%s2054_s3 + $0x98] sm:$0xff] }
 0x247   :  { %924 = vmatpush.msra.mxu1 %v885_v49  ;;  %947 = vmatpush.msra.mxu2 %v898_v50 }
 0x24d   :  { %v677_v59 = vpop.f32.mrf.mxu1 }
 0x24e   :  { %v678_v61 = vadd.f32 %v677_v59, %v577_v56  ;;  %v737_v5 = vpop.f32.mrf.mxu0  ;;  %v895_v56 = vld [vmem:[%s2054_s3 + $0x80] sm:$0xff]  ;;  %v880_v59 = vld [vmem:[%s2054_s3 + $0x8] sm:$0xff] }
 0x251   :  { %v617_v52 = vpop.f32.mrf.mxu2 }
 0x252   :  { %v618_v53 = vadd.f32 %v617_v52, %v598_v51  ;;  %v637_v54 = vpop.f32.mrf.mxu3  ;;  %v884_v51 = vld [vmem:[%s2054_s3 + $0x28] sm:$0xff]  ;;  %v897_v52 = vld [vmem:[%s2054_s3 + $0x90] sm:$0xff] }
 0x253   :  { %925 = vmatpush.msra.mxu1 %v884_v51  ;;  %948 = vmatpush.msra.mxu2 %v897_v52  ;;  %v1543_v52 = vld [vmem:[#allocation4 + $0x13] ss:$0 sm:$0xff] }
 0x254   :  { %v638_v58 = vadd.f32 %v637_v54, %v618_v53  ;;  %v883_v53 = vld [vmem:[%s2054_s3 + $0x20] sm:$0xff]  ;;  %v896_v54 = vld [vmem:[%s2054_s3 + $0x88] sm:$0xff] }
 0x255   :  { %926 = vmatpush.msra.mxu1 %v883_v53  ;;  %949 = vmatpush.msra.mxu2 %v896_v54 }
 0x256   :  { %v658_v60 = vadd.f32 %v657_v55, %v638_v58  ;;  %v882_v55 = vld [vmem:[%s2054_s3 + $0x18] sm:$0xff]  ;;  %v881_v58 = vld [vmem:[%s2054_s3 + $0x10] sm:$0xff] }
 0x257   :  { %927 = vmatpush.msra.mxu1 %v882_v55  ;;  %950 = vmatpush.msra.mxu2 %v895_v56 }
 0x258   :  { %v1807_v62 = vmax.f32 %v658_v60, 0.0  ;;  %v879_v60 = vld [vmem:[%s2054_s3] sm:$0xff] }
 0x259   :  { %v697_v63 = vpop.f32.mrf.mxu2  ;;  %928 = vmatpush.msra.mxu1 %v881_v58 }
 0x25a   :  { %v744_v0 = vmul.f32 %v1807_v62, %v1807_v62  ;;  %v698_v1 = vadd.f32 %v697_v63, %v678_v61  ;;  %v717_v2 = vpop.f32.mrf.mxu3  ;;  %v742_v61 = vld [vmem:[#allocation4 + $0xe] sm:$0x3] }
 0x25b   :  { %929 = vmatpush.msra.mxu1 %v880_v59  ;;  %v1542_v59 = vld [vmem:[#allocation4 + $0x1a] ss:$0 sm:$0xff] }
 0x25c   :  { %v718_v3 = vadd.f32 %v717_v2, %v698_v1  ;;  %v748_v4 = vrot.slane %v744_v0, 5  ;;  %v743_v0 = vld [vmem:[#allocation4 + $0x10] sm:$0x3] }
 0x25d   :  { %930 = vmatpush.msra.mxu1 %v879_v60  ;;  %v873_v13 = vperm.slane %v743_v0, 0 }
 0x25e   :  { %v738_v6 = vadd.f32 %v737_v5, %v718_v3  ;;  %v752_v7 = vsel %vm213_vm1, %v1807_v62, %v748_v4  ;;  %v867_v3 = vperm.slane %v742_v61, 1  ;;  %v874_v5 = vperm.slane %v743_v0, 1 }
 0x25f   :  { %770 = vmatmul.f32.vlgmr.msrb.gmra.mxu1 %v752_v7 }
 0x260   :  { %v1813_v57 = vmax.f32 %v738_v6, 0.0 }
 0x262   :  { %v745_v8 = vmul.f32 %v1813_v57, %v1813_v57 }
 0x264   :  { %v749_v9 = vrot.slane %v745_v8, 5 }
 0x266   :  { %v753_v10 = vsel %vm213_vm1, %v1813_v57, %v749_v9 }
 0x267   :  { %790 = vmatmul.f32.vlgmr.msrb.gmra.mxu2 %v753_v10  ;;  %v866_v10 = vperm.slane %v742_v61, 0  ;;  %v1545_v61 = vld [vmem:[#allocation4 + $0x1b] ss:$0 sm:$0xff] }
 0x2dc   :  { %v771_v11 = vpop.f32.mrf.mxu1 }
 0x2ea   :  { %v791_v12 = vpop.f32.mrf.mxu2 }
 0x2eb   :  { %v792_v15 = vadd.f32 %v791_v12, %v771_v11 }
 0x2ed   :  { %v794_v19 = vmul.f32 0.03125, %v792_v15 }
 0x2ef   :  { %v795_v23 = vmul.f32 %v794_v19, %v794_v19 }
 0x2f1   :  { %v797_v26 = vrot.slane %v795_v23, 5  ;;  %v976_v23 = vld [vmem:[%s2055_s4 + $0x30] sm:$0xff] }
 0x2f3   :  { %v799_v30 = vsub.f32 %v794_v19, %v797_v26 }
 0x2f5   :  { %v800_v34 = vadd.f32 1e-05, %v799_v30 }
 0x2f7   :  { %1559 = vrsqrt.f32 %v800_v34  ;;  %vm807_vm7 = vweird.f32 %v800_v34 }
 0x2fd   :  { %v1560_v40 = vpop.eup %1559 }
 0x2fe   :  { %v802_v41 = vmul.f32 %v1560_v40, %v800_v34  ;;  %vm808_vm6 = vweird.f32 %v1560_v40 }
 0x2ff   :  { %vm809_vm8 = vmor %vm807_vm7, %vm808_vm6  ;;  %vm1173_vm6 = vcmask 23552  }
 0x300   :  { %v803_v42 = vmul.f32 %v1560_v40, %v802_v41  ;;  %v1012_v41 = vld [vmem:[%s2055_s4 + $0x98] sm:$0xff] }
 0x301   :  { %1028 = vmatpush.msrb.mxu0 %v1012_v41  ;;  %v1547_v41 = vld [vmem:[#allocation4 + $0x17] ss:$0 sm:$0xff] }
 0x302   :  { %v804_v43 = vmul.f32 0.5, %v803_v42  ;;  %v1011_v42 = vld [vmem:[%s2055_s4 + $0x68] sm:$0xff] }
 0x303   :  { %1029 = vmatpush.msrb.mxu0 %v1011_v42 }
 0x304   :  { %v805_v45 = vsub.f32 1.5, %v804_v43  ;;  %v1010_v43 = vld [vmem:[%s2055_s4 + $0x38] sm:$0xff] }
 0x305   :  { %1030 = vmatpush.msrb.mxu0 %v1010_v43 }
 0x306   :  { %v806_v46 = vmul.f32 %v1560_v40, %v805_v45 }
 0x308   :  { %v810_v47 = vsel %vm809_vm8, %v1560_v40, %v806_v46 }
 0x309   :  { %v811_v20 = vsel %vm213_vm1, %v794_v19, %v810_v47 }
 0x30a   :  { %1506 = vmatmul.msk.f32.vlgmr.msrb.gmra.mxu3 %vm316_vm5, %v811_v20  ;;  %1507 = vmatmul.msk.f32.vlgmr.msra.gmra.mxu0 %vm316_vm5, %v811_v20  ;;  %v1009_v20 = vld [vmem:[%s2055_s4 + $0x8] sm:$0xff] }
 0x30b   :  { %1031 = vmatpush.msrb.mxu0 %v1009_v20  ;;  %v1549_v20 = vld [vmem:[#allocation4 + $0x19] ss:$0 sm:$0xff] }
 0x387   :  { %v852_v63 = vpop.f32.mrf.mxu0 }
 0x388   :  { %v856_v1 = vsub.f32 %v1813_v57, %v852_v63  ;;  %v860_v2 = vrot.slane %v852_v63, 3 }
 0x38a   :  { %v864_v4 = vmul.f32 %v860_v2, %v856_v1 }
 0x38c   :  { %v871_v6 = vmul.f32 %v867_v3, %v864_v4  ;;  %v1544_v4 = vld [vmem:[#allocation4 + $0x15] ss:$0 sm:$0xff] }
 0x38d   :  { %v832_v7 = vpop.f32.mrf.mxu3 }
 0x38e   :  { %v855_v8 = vsub.f32 %v1807_v62, %v832_v7  ;;  %v859_v9 = vrot.slane %v832_v7, 3  ;;  %v878_v11 = vadd.f32 %v874_v5, %v871_v6  ;;  %v977_v62 = vld [vmem:[%s2055_s4 + $0x60] sm:$0xff]  ;;  %v1541_v5 = vld [vmem:[#allocation4 + $0x14] ss:$0 sm:$0xff] }
 0x38f   :  { %1002 = vmatpush.msra.mxu3 %v977_v62 }
 0x390   :  { %v863_v12 = vmul.f32 %v859_v9, %v855_v8  ;;  %951 = vmatmul.f32.vlgmr.msra.gmra.mxu2 %v878_v11  ;;  %v1546_v9 = vld [vmem:[#allocation4 + $0x16] ss:$0 sm:$0xff] }
 0x391   :  { %1003 = vmatpush.msra.mxu3 %v976_v23 }
 0x392   :  { %v870_v14 = vmul.f32 %v866_v10, %v863_v12 }
 0x393   :  { %1004 = vmatpush.msra.mxu3 %v975_v25 }
 0x394   :  { %v877_v15 = vadd.f32 %v873_v13, %v870_v14 }
 0x396   :  { %931 = vmatmul.f32.vlgmr.msra.gmra.mxu1 %v877_v15  ;;  %v1648_v15 = vmov 32.0  }
 0x413   :  { %v932_v17 = vpop.f32.mrf.mxu1  ;;  %v952_v18 = vpop.f32.mrf.mxu2 }
 0x414   :  { %v933_v57 = vadd.f32 %v1540_v16, %v932_v17 }
 0x416   :  { %v953_v19 = vadd.f32 %v952_v18, %v933_v57 }
 0x418   :  { %v955_v22 = vsub.f32 0.0, %v953_v19  ;;  %1561 = vtanh.f32 %v953_v19 }
 0x41a   :  { %v956_v24 = vmul.f32 1.442695, %v955_v22 }
 0x41c   :  { %1563 = vpow2.f32 %v956_v24 }
 0x41e   :  { %v1562_v26 = vpop.eup %1561 }
 0x41f   :  { %984 = vrot.lane.b32.xlu0 %v1562_v26, %s1645_s8  ;;  %v1117_v26 = vld [vmem:[%s2055_s4 + $0xa0] sm:$0xff] }
 0x420   :  { %1137 = vmatpush.msrb.mxu3 %v1117_v26 }
 0x422   :  { %v1564_v27 = vpop.eup %1563 }
 0x423   :  { %v958_v29 = vadd.f32 1.0, %v1564_v27  ;;  %v1116_v27 = vld [vmem:[%s2055_s4 + $0x70] sm:$0xff] }
 0x424   :  { %1138 = vmatpush.msrb.mxu3 %v1116_v27 }
 0x425   :  { %1565 = vrcp.f32 %v958_v29  ;;  %v970_v34 = vand.u32 2147483648, %v958_v29  ;;  %v968_v35 = vand.u32 2147483647, %v958_v29  ;;  %vm964_vm10 = vweird.f32 %v958_v29 }
 0x426   :  { %1567 = vrcp.f32 %v1647_v32 }
 0x427   :  { %v971_v38 = vor.u32 1.1754944e-38, %v970_v34  ;;  %vm969_vm13 = vcmp.eq.f32.partialorder %v968_v35, 8.507059e+37  ;;  %1569 = vrcp.f32 %v1648_v15 }
 0x42b   :  { %v1566_v30 = vpop.eup %1565 }
 0x42c   :  { %v960_v31 = vmul.f32 %v1566_v30, %v958_v29  ;;  %vm965_vm9 = vweird.f32 %v1566_v30  ;;  %v1568_v48 = vpop.eup %1567  ;;  %v1115_v29 = vld [vmem:[%s2055_s4 + $0x40] sm:$0xff] }
 0x42d   :  { %vm966_vm11 = vmor %vm964_vm10, %vm965_vm9  ;;  %v1041_v49 = vmul.f32 3.0, %v1568_v48  ;;  %vm1045_vm15 = vweird.f32 %v1568_v48  ;;  %v1570_v16 = vpop.eup %1569  ;;  %1139 = vmatpush.msrb.mxu3 %v1115_v29 }
 0x42e   :  { %v961_v33 = vsub.f32 1.0, %v960_v31  ;;  %v1081_v17 = vmul.f32 32.0, %v1570_v16  ;;  %vm1085_vm2 = vweird.f32 %v1570_v16 }
 0x42f   :  { %v1042_v50 = vsub.f32 1.0, %v1041_v49 }
 0x430   :  { %v962_v28 = vmul.f32 %v1566_v30, %v961_v33  ;;  %v1082_v57 = vsub.f32 1.0, %v1081_v17 }
 0x431   :  { %v1043_v51 = vmul.f32 %v1568_v48, %v1042_v50 }
 0x432   :  { %v963_v36 = vadd.f32 %v1566_v30, %v962_v28  ;;  %v1083_v18 = vmul.f32 %v1570_v16, %v1082_v57 }
 0x433   :  { %v1044_v53 = vadd.f32 %v1568_v48, %v1043_v51 }
 0x434   :  { %v967_v37 = vsel %vm966_vm11, %v1566_v30, %v963_v36  ;;  %v1084_v19 = vadd.f32 %v1570_v16, %v1083_v18  ;;  %v1114_v30 = vld [vmem:[%s2055_s4 + $0x10] sm:$0xff] }
 0x435   :  { %v1932_v39 = vsel %vm969_vm13, %v971_v38, %v967_v37  ;;  %v1046_v58 = vsel %vm1045_vm15, %v1568_v48, %v1044_v53  ;;  %1140 = vmatpush.msrb.mxu3 %v1114_v30 }
 0x436   :  { %1049 = vrot.lane.b32.xlu0 %v1932_v39, %s1646_s9  ;;  %v1037_v40 = vsel %vm1036_vm12, %v1932_v39, 0.0  ;;  %v1959_v21 = vsel %vm1085_vm2, %v1570_v16, %v1084_v19  ;;  %v1539_v16 = vld [vmem:[#allocation4 + $0x20] ss:$0 sm:$0xff] }
 0x437   :  { %1038 = vadd.xlane.f32.xlu1 %v1037_v40  ;;  %v1318_v18 = vadd.f32 %v1539_v16, %v1778_v44 }
 0x491   :  { %v985_v45 = vpop.permute.xlu0 %984 }
 0x492   :  { %1508 = vmatmul.msk.f32.vlgmr.msra.gmra.mxu3 %vm986_vm14, %v985_v45  ;;  %v1548_v45 = vld [vmem:[#allocation4 + $0x18] ss:$0 sm:$0xff] }
 0x4a8   :  { %v1050_v46 = vpop.permute.xlu0 %1049 }
 0x4a9   :  { %v1052_v47 = vsel %vm1036_vm12, %v1050_v46, 0.0 }
 0x4aa   :  { %1053 = vadd.xlane.f32.xlu1 %v1052_v47  ;;  %v1039_v54 = vpop.xlane.xlu1 %1038 }
 0x4ab   :  { %v1047_v60 = vmul.f32 %v1046_v58, %v1039_v54 }
 0x4ad   :  { %v1213_v1 = vmul.f32 %v1542_v59, %v1047_v60  ;;  %v1060_v7 = vmul.f32 %v1541_v5, %v1047_v60  ;;  %v1170_v59 = vld [vmem:[%s2055_s4 + $0x58] sm:$0xff]  ;;  %v1169_v60 = vld [vmem:[%s2055_s4 + $0x28] sm:$0xff] }
 0x515   :  { %v1006_v55 = vpop.f32.mrf.mxu3 }
 0x516   :  { %v1952_v56 = vadd.f32 %v1543_v52, %v1006_v55  ;;  %v1172_v55 = vld [vmem:[%s2055_s4 + $0xb8] sm:$0xff] }
 0x517   :  { %1511 = vmatpush.xpose.msk.msra.mxu0 %vm1173_vm6, %v1172_v55 }
 0x518   :  { %1509 = vmatmul.msk.f32.vlgmr.msrb.gmra.mxu0 %vm986_vm14, %v1952_v56 }
 0x51d   :  { %v1054_v63 = vpop.xlane.xlu1 %1053 }
 0x51e   :  { %v1055_v0 = vmul.f32 %v1054_v63, %v1046_v58  ;;  %v1171_v58 = vld [vmem:[%s2055_s4 + $0x88] sm:$0xff] }
 0x51f   :  { %1512 = vmatpush.xpose.msk.msra.mxu0 %vm1173_vm6, %v1171_v58 }
 0x520   :  { %v1218_v2 = vmul.f32 %v1545_v61, %v1055_v0  ;;  %v1065_v6 = vmul.f32 %v1544_v4, %v1055_v0 }
 0x522   :  { %v1956_v3 = vadd.f32 %v1218_v2, %v1213_v1  ;;  %v1066_v8 = vadd.f32 %v1065_v6, %v1060_v7 }
 0x523   :  { %1513 = vmatpush.xpose.msk.msra.mxu0 %vm1173_vm6, %v1170_v59 }
 0x527   :  { %1514 = vmatpush.xpose.msk.msra.mxu0 %vm1173_vm6, %v1169_v60  ;;  %v1553_v60 = vld [vmem:[#allocation4 + $0x1e] ss:$0 sm:$0xff] }
 0x595   :  { %v1033_v10 = vpop.f32.mrf.mxu0 }
 0x596   :  { %v1067_v11 = vadd.f32 %v1066_v8, %v1033_v10 }
 0x598   :  { %v1072_v12 = vadd.f32 %v1546_v9, %v1067_v11 }
 0x59a   :  { %v1073_v13 = vmax.f32 %v1072_v12, 0.0 }
 0x59c   :  { %v1077_v14 = vsel %vm1076_vm0, %v1073_v13, 0.0 }
 0x59d   :  { %1078 = vadd.xlane.f32.xlu2 %v1077_v14 }
 0x610   :  { %v1079_v62 = vpop.xlane.xlu2 %1078 }
 0x611   :  { %v1087_v22 = vmul.f32 %v1959_v21, %v1079_v62  ;;  %v1319_v62 = vmax.f32 %v1318_v18, 0.0 }
 0x613   :  { %v1088_v23 = vsub.f32 %v1073_v13, %v1087_v22  ;;  %v1550_v13 = vld [vmem:[#allocation4 + $0x1c] ss:$0 sm:$0xff]  ;;  %v1322_v22 = vsel %vm1076_vm0, %v1319_v62, 0.0 }
 0x615   :  { %v1089_v24 = vmul.f32 %v1088_v23, %v1088_v23 }
 0x617   :  { %v1090_v25 = vsel %vm1076_vm0, %v1089_v24, 0.0 }
 0x618   :  { %1091 = vadd.xlane.f32.xlu2 %v1090_v25 }
 0x630   :  { %1221 = vrot.lane.b32.xlu2 %v1033_v10, %s1649_s5 }
 0x68b   :  { %v1092_v31 = vpop.xlane.xlu2 %1091 }
 0x68c   :  { %v1093_v33 = vmul.f32 %v1092_v31, %v1959_v21 }
 0x68e   :  { %v1094_v34 = vadd.f32 1e-05, %v1093_v33  ;;  %v1267_v33 = vld [vmem:[%s2055_s4 + $0xa8] sm:$0xff] }
 0x68f   :  { %1287 = vmatpush.msra.mxu3 %v1267_v33 }
 0x690   :  { %1571 = vrsqrt.f32 %v1094_v34  ;;  %vm1101_vm4 = vweird.f32 %v1094_v34 }
 0x693   :  { %v1222_v11 = vpop.permute.xlu2 %1221 }
 0x694   :  { %v1224_v12 = vadd.f32 %v1222_v11, %v1956_v3 }
 0x696   :  { %v1572_v28 = vpop.eup %1571 }
 0x697   :  { %v1096_v35 = vmul.f32 %v1572_v28, %v1094_v34  ;;  %vm1102_vm3 = vweird.f32 %v1572_v28  ;;  %v1266_v34 = vld [vmem:[%s2055_s4 + $0x78] sm:$0xff] }
 0x698   :  { %vm1103_vm5 = vmor %vm1101_vm4, %vm1102_vm3  ;;  %1288 = vmatpush.msra.mxu3 %v1266_v34 }
 0x699   :  { %v1097_v36 = vmul.f32 %v1572_v28, %v1096_v35  ;;  %v1264_v35 = vld [vmem:[%s2055_s4 + $0x18] sm:$0xff] }
 0x69b   :  { %v1098_v38 = vmul.f32 0.5, %v1097_v36  ;;  %v1355_v36 = vld [vmem:[%s2055_s4 + $0xb0] sm:$0xff] }
 0x69d   :  { %v1099_v37 = vsub.f32 1.5, %v1098_v38 }
 0x69f   :  { %v1100_v40 = vmul.f32 %v1572_v28, %v1099_v37  ;;  %v1354_v37 = vld [vmem:[%s2055_s4 + $0x80] sm:$0xff] }
 0x6a1   :  { %v1104_v42 = vsel %vm1103_vm5, %v1572_v28, %v1100_v40  ;;  %v1265_v28 = vld [vmem:[%s2055_s4 + $0x48] sm:$0xff] }
 0x6a2   :  { %v1105_v43 = vmul.f32 %v1104_v42, %v1088_v23  ;;  %1289 = vmatpush.msra.mxu3 %v1265_v28  ;;  %v1352_v42 = vld [vmem:[%s2055_s4 + $0x20] sm:$0xff] }
 0x6a4   :  { %v1109_v46 = vmul.f32 %v1547_v41, %v1105_v43  ;;  %1290 = vmatpush.msra.mxu3 %v1264_v35  ;;  %v1353_v41 = vld [vmem:[%s2055_s4 + $0x50] sm:$0xff]  ;;  %s1653_s4 = smov 2  }
 0x6a6   :  { %v1113_v47 = vadd.f32 %v1548_v45, %v1109_v46 }
 0x6a8   :  { %1510 = vmatmul.msk.f32.vlgmr.msrb.gmra.mxu3 %vm986_vm14, %v1113_v47 }
 0x6a9   :  { %1375 = vmatpush.msrb.mxu3 %v1355_v36 }
 0x6ab   :  { %1376 = vmatpush.msrb.mxu3 %v1354_v37 }
 0x6ad   :  { %1377 = vmatpush.msrb.mxu3 %v1353_v41 }
 0x6af   :  { %1378 = vmatpush.msrb.mxu3 %v1352_v42 }
 0x72b   :  { %v1142_v32 = vpop.f32.mrf.mxu3 }
 0x72c   :  { %v1143_v48 = vadd.f32 %v1549_v20, %v1142_v32 }
 0x72e   :  { %v1145_v49 = vsel %vm1036_vm12, %v1143_v48, -inf }
 0x72f   :  { %1146 = vmax.xlane.f32.xlu0 %v1145_v49 }
 0x7a2   :  { %v1147_v50 = vpop.xlane.xlu0 %1146 }
 0x7a3   :  { %v1148_v51 = vsub.f32 %v1143_v48, %v1147_v50 }
 0x7a5   :  { %v1149_v52 = vmul.f32 1.442695, %v1148_v51 }
 0x7a7   :  { %1573 = vpow2.f32 %v1149_v52 }
 0x7ad   :  { %v1574_v53 = vpop.eup %1573 }
 0x7ae   :  { %v1151_v54 = vsel %vm1036_vm12, %v1574_v53, 0.0 }
 0x7af   :  { %1152 = vadd.xlane.f32.xlu1 %v1151_v54  ;;  %v1551_v54 = vld [vmem:[#allocation4 + $0x1d] ss:$0 sm:$0xff] }
 0x822   :  { %v1153_v61 = vpop.xlane.xlu1 %1152 }
 0x823   :  { %1575 = vrcp.f32 %v1153_v61  ;;  %v1165_v2 = vand.u32 2147483648, %v1153_v61  ;;  %v1163_v5 = vand.u32 2147483647, %v1153_v61  ;;  %vm1159_vm8 = vweird.f32 %v1153_v61 }
 0x825   :  { %v1166_v7 = vor.u32 1.1754944e-38, %v1165_v2  ;;  %vm1164_vm10 = vcmp.eq.f32.partialorder %v1163_v5, 8.507059e+37  ;;  %v1552_v2 = vld [vmem:[#allocation4 + $0x21] ss:$0 sm:$0xff] }
 0x829   :  { %v1576_v63 = vpop.eup %1575 }
 0x82a   :  { %v1155_v0 = vmul.f32 %v1576_v63, %v1153_v61  ;;  %vm1160_vm7 = vweird.f32 %v1576_v63 }
 0x82b   :  { %vm1161_vm9 = vmor %vm1159_vm8, %vm1160_vm7 }
 0x82c   :  { %v1156_v1 = vsub.f32 1.0, %v1155_v0 }
 0x82e   :  { %v1157_v4 = vmul.f32 %v1576_v63, %v1156_v1 }
 0x830   :  { %v1158_v6 = vadd.f32 %v1576_v63, %v1157_v4 }
 0x832   :  { %v1162_v8 = vsel %vm1161_vm9, %v1576_v63, %v1158_v6  ;;  %v1554_v6 = vld [vmem:[#allocation4 + $0x22] ss:$0 sm:$0xff] }
 0x833   :  { %v1167_v9 = vsel %vm1164_vm10, %v1166_v7, %v1162_v8 }
 0x834   :  { %v1995_v10 = vmul.f32 %v1574_v53, %v1167_v9  ;;  %v1650_v9 = vmov 1  }
 0x835   :  { %1535 = vset.pattern.permute.xlu1 %v1650_v9 }
 0x836   :  { %1515 = vmatmul.msk.f32.vlgmr.msra.gmra.mxu0 %vm1173_vm6, %v1995_v10 }
 0x8b3   :  { %v1206_v14 = vpop.f32.mrf.mxu0 }
 0x8b4   :  { %v1225_v15 = vadd.f32 %v1224_v12, %v1206_v14  ;;  %v1556_v12 = vld [vmem:[#allocation4 + $0x23] ss:$0 sm:$0xff]  ;;  %v1555_v14 = vld [vmem:[#allocation4 + $0x1f] ss:$0 sm:$0xff] }
 0x8b6   :  { %v1230_v17 = vadd.f32 %v1550_v13, %v1225_v15 }
 0x8b8   :  { %v1231_v57 = vmax.f32 %v1230_v17, 0.0 }
 0x8ba   :  { %v1234_v19 = vsel %vm1076_vm0, %v1231_v57, 0.0 }
 0x8bb   :  { %1235 = vadd.xlane.f32.xlu1 %v1234_v19  ;;  %v1651_v19 = vmov 2  }
 0x8bc   :  { %1538 = vset.pattern.permute.xlu0 %v1651_v19 }
 0x8c3   :  { %1323 = vadd.xlane.f32.xlu1 %v1322_v22 }
 0x92e   :  { %v1236_v23 = vpop.xlane.xlu1 %1235 }
 0x92f   :  { %v1237_v24 = vmul.f32 %v1236_v23, %v1959_v21 }
 0x931   :  { %v1238_v25 = vsub.f32 %v1231_v57, %v1237_v24 }
 0x933   :  { %v1239_v3 = vmul.f32 %v1238_v25, %v1238_v25 }
 0x935   :  { %v1240_v26 = vsel %vm1076_vm0, %v1239_v3, 0.0 }
 0x936   :  { %1241 = vadd.xlane.f32.xlu1 %v1240_v26  ;;  %v1324_v27 = vpop.xlane.xlu1 %1323 }
 0x937   :  { %v1325_v29 = vmul.f32 %v1324_v27, %v1959_v21 }
 0x939   :  { %v1326_v30 = vsub.f32 %v1319_v62, %v1325_v29 }
 0x93b   :  { %v1327_v44 = vmul.f32 %v1326_v30, %v1326_v30 }
 0x93d   :  { %v1328_v31 = vsel %vm1076_vm0, %v1327_v44, 0.0 }
 0x93e   :  { %1329 = vadd.xlane.f32.xlu2 %v1328_v31 }
 0x9a9   :  { %v1242_v38 = vpop.xlane.xlu1 %1241 }
 0x9aa   :  { %v1243_v40 = vmul.f32 %v1242_v38, %v1959_v21  ;;  %v1652_v38 = vmov 0  }
 0x9ac   :  { %v1244_v43 = vadd.f32 1e-05, %v1243_v40 }
 0x9ae   :  { %1577 = vrsqrt.f32 %v1244_v43  ;;  %vm1251_vm13 = vweird.f32 %v1244_v43 }
 0x9b1   :  { %v1330_v45 = vpop.xlane.xlu2 %1329 }
 0x9b2   :  { %v1331_v46 = vmul.f32 %v1330_v45, %v1959_v21 }
 0x9b4   :  { %v1578_v47 = vpop.eup %1577  ;;  %v1332_v20 = vadd.f32 1e-05, %v1331_v46 }
 0x9b5   :  { %v1246_v32 = vmul.f32 %v1578_v47, %v1244_v43  ;;  %vm1252_vm11 = vweird.f32 %v1578_v47 }
 0x9b6   :  { %1579 = vrsqrt.f32 %v1332_v20  ;;  %vm1253_vm15 = vmor %vm1251_vm13, %vm1252_vm11  ;;  %vm1339_vm2 = vweird.f32 %v1332_v20 }
 0x9b7   :  { %v1247_v48 = vmul.f32 %v1578_v47, %v1246_v32 }
 0x9b9   :  { %v1248_v49 = vmul.f32 0.5, %v1247_v48 }
 0x9bb   :  { %v1249_v50 = vsub.f32 1.5, %v1248_v49 }
 0x9bc   :  { %v1580_v51 = vpop.eup %1579 }
 0x9bd   :  { %v1250_v52 = vmul.f32 %v1578_v47, %v1249_v50  ;;  %v1334_v53 = vmul.f32 %v1580_v51, %v1332_v20  ;;  %vm1340_vm0 = vweird.f32 %v1580_v51  ;;  %v1402_v20 = vlaneseq }
 0x9be   :  { %vm1341_vm3 = vmor %vm1339_vm2, %vm1340_vm0 }
 0x9bf   :  { %v1254_v55 = vsel %vm1253_vm15, %v1578_v47, %v1250_v52  ;;  %v1335_v58 = vmul.f32 %v1580_v51, %v1334_v53  ;;  %v1403_v32 = vand.u32 127, %v1402_v20 }
 0x9c0   :  { %v1255_v59 = vmul.f32 %v1254_v55, %v1238_v25 }
 0x9c1   :  { %v1336_v61 = vmul.f32 0.5, %v1335_v58  ;;  %vm1405_vm13 = vcmp.eq.s32.totalorder %v1403_v32, 1  ;;  %vm1404_vm15 = vcmp.eq.s32.totalorder %v1403_v32, 0 }
 0x9c2   :  { %v1259_v21 = vmul.f32 %v1551_v54, %v1255_v59 }
 0x9c3   :  { %v1337_v63 = vsub.f32 1.5, %v1336_v61 }
 0x9c4   :  { %v1263_v0 = vadd.f32 %v1553_v60, %v1259_v21 }
 0x9c5   :  { %v1338_v1 = vmul.f32 %v1580_v51, %v1337_v63 }
 0x9c6   :  { %1516 = vmatmul.msk.f32.vlgmr.msra.gmra.mxu3 %vm986_vm14, %v1263_v0 }
 0x9c7   :  { %v1342_v4 = vsel %vm1341_vm3, %v1580_v51, %v1338_v1 }
 0x9c8   :  { %v1343_v5 = vmul.f32 %v1342_v4, %v1326_v30 }
 0x9ca   :  { %v1347_v7 = vmul.f32 %v1552_v2, %v1343_v5 }
 0x9cc   :  { %v1351_v8 = vadd.f32 %v1554_v6, %v1347_v7 }
 0x9ce   :  { %1517 = vmatmul.msk.f32.vlgmr.msrb.gmra.mxu3 %vm986_vm14, %v1351_v8 }
 0xa49   :  { %v1292_v11 = vpop.f32.mrf.mxu3 }
 0xa4a   :  { %v1293_v17 = vadd.f32 %v1555_v14, %v1292_v11 }
 0xa4c   :  { %v1295_v18 = vsub.f32 0.0, %v1293_v17 }
 0xa4e   :  { %v1296_v22 = vmul.f32 1.442695, %v1295_v18 }
 0xa51   :  { %v1380_v13 = vpop.f32.mrf.mxu3 }
 0xa52   :  { %v1381_v15 = vadd.f32 %v1556_v12, %v1380_v13 }
 0xa54   :  { %v1383_v16 = vsub.f32 0.0, %v1381_v15 }
 0xa56   :  { %v1384_v57 = vmul.f32 1.442695, %v1383_v16 }
 0xa58   :  { %1581 = vpow2.f32 %v1384_v57 }
 0xa5e   :  { %v1582_v62 = vpop.eup %1581 }
 0xa5f   :  { %v1386_v23 = vadd.f32 1.0, %v1582_v62 }
 0xa61   :  { %1583 = vrcp.f32 %v1386_v23  ;;  %v1398_v29 = vand.u32 2147483648, %v1386_v23  ;;  %v1396_v44 = vand.u32 2147483647, %v1386_v23  ;;  %vm1392_vm4 = vweird.f32 %v1386_v23 }
 0xa62   :  { %1585 = vpow2.f32 %v1296_v22 }
 0xa63   :  { %v1399_v33 = vor.u32 1.1754944e-38, %v1398_v29  ;;  %vm1397_vm7 = vcmp.eq.f32.partialorder %v1396_v44, 8.507059e+37 }
 0xa67   :  { %v1584_v24 = vpop.eup %1583 }
 0xa68   :  { %v1586_v25 = vpop.eup %1585  ;;  %v1388_v3 = vmul.f32 %v1584_v24, %v1386_v23  ;;  %vm1393_vm14 = vweird.f32 %v1584_v24 }
 0xa69   :  { %v1298_v27 = vadd.f32 1.0, %v1586_v25  ;;  %vm1394_vm5 = vmor %vm1392_vm4, %vm1393_vm14  ;;  %vm1474_vm14 = vcmask 7168   ;;  %vm1476_vm4 = vcmask 15360  }
 0xa6a   :  { %v1389_v26 = vsub.f32 1.0, %v1388_v3 }
 0xa6b   :  { %1587 = vrcp.f32 %v1298_v27  ;;  %v1310_v42 = vand.u32 2147483648, %v1298_v27  ;;  %vm1304_vm9 = vweird.f32 %v1298_v27  ;;  %v1308_v43 = vand.u32 2147483647, %v1298_v27 }
 0xa6c   :  { %v1390_v30 = vmul.f32 %v1584_v24, %v1389_v26 }
 0xa6d   :  { %v1311_v46 = vor.u32 1.1754944e-38, %v1310_v42  ;;  %vm1309_vm11 = vcmp.eq.f32.partialorder %v1308_v43, 8.507059e+37 }
 0xa6e   :  { %v1391_v31 = vadd.f32 %v1584_v24, %v1390_v30 }
 0xa70   :  { %v1395_v34 = vsel %vm1394_vm5, %v1584_v24, %v1391_v31  ;;  %vm1479_vm5 = vcmask 285696  }
 0xa71   :  { %v1400_v28 = vsel %vm1397_vm7, %v1399_v33, %v1395_v34  ;;  %v1588_v35 = vpop.eup %1587  ;;  %vm1481_vm7 = vcmask 310272  }
 0xa72   :  { %1419 = vperm.xlu1 %1535, %v1400_v28   ;;  %v1300_v36 = vmul.f32 %v1588_v35, %v1298_v27  ;;  %vm1305_vm8 = vweird.f32 %v1588_v35 }
 0xa73   :  { %vm1306_vm10 = vmor %vm1304_vm9, %vm1305_vm8  ;;  %vm1483_vm8 = vcmask 334848   ;;  %vm1485_vm9 = vcmask 359424  }
 0xa74   :  { %v1301_v37 = vsub.f32 1.0, %v1300_v36 }
 0xa76   :  { %v1302_v40 = vmul.f32 %v1588_v35, %v1301_v37 }
 0xa78   :  { %v1303_v41 = vadd.f32 %v1588_v35, %v1302_v40 }
 0xa7a   :  { %1536 = vset.pattern.permute.xlu1 %v1652_v38  ;;  %v1307_v45 = vsel %vm1306_vm10, %v1588_v35, %v1303_v41 }
 0xa7b   :  { %1408 = vperm.xlu1 %1536, %v1400_v28   ;;  %v1312_v47 = vsel %vm1309_vm11, %v1311_v46, %v1307_v45 }
 0xa83   :  { %1537 = vset.pattern.permute.xlu1 %v1651_v19 }
 0xa84   :  { %1452 = vperm.xlu1 %1537, %v1400_v28  }
 0xa8c   :  { %1458 = vrot.lane.b32.xlu1 %v1312_v47, %s1653_s4 }
 0xa94   :  { %1465 = vrot.lane.b32.xlu1 %v1932_v39, %s1654_s19 }
 0xa9c   :  { %1468 = vrot.lane.b32.xlu1 %v1995_v10, %s1655_s20 }
 0xaa4   :  { %1471 = vrot.lane.b32.xlu1 %v1400_v28, %s1656_s21 }
 0xae4   :  { %v1420_v48 = vpop.permute.xlu1 %1419 }
 0xae5   :  { %v1422_v49 = vrot.slane %v1420_v48, 1 }
 0xae7   :  { %v1424_v50 = vsel %vm1405_vm13, %v1420_v48, %v1422_v49 }
 0xae8   :  { %v1426_v51 = vrot.slane %v1424_v50, 1 }
 0xaea   :  { %v1428_v52 = vsel %vm1404_vm15, %v1420_v48, %v1426_v51 }
 0xaeb   :  { %v1436_v53 = vperm.slane %v1428_v52, 0 }
 0xaed   :  { %1438 = vrot.lane.b32.xlu0 %v1436_v53, %s1657_s22  ;;  %v1409_v54 = vpop.permute.xlu1 %1408 }
 0xaee   :  { %v1411_v55 = vrot.slane %v1409_v54, 1 }
 0xaf0   :  { %v1413_v58 = vsel %vm1405_vm13, %v1409_v54, %v1411_v55 }
 0xaf1   :  { %v1415_v59 = vrot.slane %v1413_v58, 1 }
 0xaf3   :  { %v1417_v60 = vsel %vm1404_vm15, %v1409_v54, %v1415_v59 }
 0xaf4   :  { %v1429_v10 = vperm.slane %v1417_v60, 0 }
 0xaf6   :  { %vm1430_vm0 = vcmp.gt.f32.partialorder %v1932_v39, %v1429_v10  ;;  %v1453_v63 = vpop.permute.xlu1 %1452 }
 0xaf7   :  { %v1431_v61 = vsel %vm1430_vm0, %v1932_v39, 0.0  ;;  %vm1455_vm2 = vcmp.gt.f32.partialorder %v1952_v56, %v1453_v63 }
 0xaf8   :  { %v1432_v21 = vsel %vm1036_vm12, %v1431_v61, 0.0  ;;  %v1456_v0 = vsel %vm1455_vm2, %v1952_v56, 0.0 }
 0xaf9   :  { %1433 = vadd.xlane.f32.xlu2 %v1432_v21 }
 0xafe   :  { %v1459_v6 = vpop.permute.xlu1 %1458 }
 0xb06   :  { %v1466_v7 = vpop.permute.xlu1 %1465 }
 0xb0e   :  { %v1469_v9 = vpop.permute.xlu1 %1468 }
 0xb11   :  { %1462 = vrot.lane.b32.xlu2 %v1456_v0, %s1657_s22 }
 0xb16   :  { %v1472_v57 = vpop.permute.xlu1 %1471 }
 0xb5f   :  { %v1439_v1 = vpop.permute.xlu0 %1438 }
 0xb60   :  { %vm1441_vm3 = vcmp.gt.f32.partialorder %v1932_v39, %v1439_v1 }
 0xb61   :  { %v1442_v2 = vsel %vm1441_vm3, %v1932_v39, 0.0 }
 0xb62   :  { %1444 = vrot.lane.b32.xlu0 %v1442_v2, %s1646_s9 }
 0xb6c   :  { %v1434_v8 = vpop.xlane.xlu2 %1433 }
 0xb6d   :  { %v1435_v12 = vmul.f32 0.33333334, %v1434_v8 }
 0xb74   :  { %v1463_v14 = vpop.permute.xlu2 %1462 }
 0xbd4   :  { %v1445_v4 = vpop.permute.xlu0 %1444 }
 0xbd5   :  { %v1447_v5 = vsel %vm1036_vm12, %v1445_v4, 0.0  ;;  %vm1487_vm12 = vcmask 384000  }
 0xbd6   :  { %1448 = vadd.xlane.f32.xlu0 %v1447_v5 }
 0xc49   :  { %v1449_v11 = vpop.xlane.xlu0 %1448 }
 0xc4a   :  { %v1450_v56 = vmul.f32 0.33333334, %v1449_v11 }
 0xc4c   :  { %v1475_v13 = vsel %vm1474_vm14, %v1435_v12, %v1450_v56 }
 0xc4d   :  { %v1477_v39 = vsel %vm1476_vm4, %v1475_v13, %v1459_v6 }
 0xc4e   :  { %v1478_v15 = vsel %vm1173_vm6, %v1477_v39, %v1463_v14 }
 0xc4f   :  { %v1480_v16 = vsel %vm1479_vm5, %v1478_v15, %v1466_v7 }
 0xc50   :  { %v1482_v17 = vsel %vm1481_vm7, %v1480_v16, %v1466_v7 }
 0xc51   :  { %v1484_v18 = vsel %vm1483_vm8, %v1482_v17, %v1469_v9 }
 0xc52   :  { %v1486_v19 = vsel %vm1485_vm9, %v1484_v18, %v1472_v57 }
 0xc53   :  { %v1488_v62 = vsel %vm1487_vm12, %v1486_v19, 0.0 }
 0xc54   :  { %v1489_v22 = vsel %vm213_vm1, %v1488_v62, 0.0 }
 0xc55   :  { %1490 = vst [vmem:[%s2058_s7] sm:$0xff] %v1489_v22 }
 0xc56   :  { %1495 = vsyncpa [#allocation3], 1 }
 0xc57   :  { %1496 = vsyncpa [#allocation5], 1 }

</bundles_post_ra>
